<compile_context>
chip_gen: v7x
topology: tpu7x:2x2x1
jax: 0.10.0
libtpu: 0.0.40
codegen_flags: <defaults>
</compile_context>

<pallas_src>
import math
from functools import partial

import jax
import jax.numpy as jnp
from jax.experimental import pallas as pl
from jax.experimental.pallas import tpu as pltpu


# ----------------------------------------------------------------------------
# Helpers: tile picking, Buffered(1) feature probe, compiler params
# ----------------------------------------------------------------------------

_TQ_TARGET = 256        # MHA query-row tile (MXU M fill; v7x megacore steps)
_FFN_ROW_TARGET = 512   # FFN row tile (HBM-roofline sweet spot on v5e/v6e)
_FFN_HID_TARGET = 2048  # FFN hidden (reduction) tile (bounds w1/w2 VMEM on v7x)


def _pick_tile(n, target, align):
    """Largest divisor of n that is <= target and a multiple of `align`; else n."""
    if n <= target:
        return n
    for d in range(target, 0, -1):
        if n % d == 0 and d % align == 0:
            return d
    return n


_BUFFERED_OK = None


def _buffered_ok():
    """Probe whether pipeline_mode=pl.Buffered(1) works in this JAX install."""
    global _BUFFERED_OK
    if _BUFFERED_OK is None:
        try:
            def _k(x_ref, o_ref):
                o_ref[...] = x_ref[...] * 2.0

            x = jnp.ones((8, 128), jnp.float32)
            out = pl.pallas_call(
                _k,
                out_shape=jax.ShapeDtypeStruct((16, 128), jnp.float32),
                grid=(2,),
                in_specs=[pl.BlockSpec((8, 128), lambda i: (0, 0),
                                       pipeline_mode=pl.Buffered(1))],
                out_specs=pl.BlockSpec((8, 128), lambda i: (i, 0)),
            )(x)
            jax.block_until_ready(out)
            _BUFFERED_OK = True
        except Exception:
            _BUFFERED_OK = False
    return _BUFFERED_OK


def _const_spec(shape):
    """BlockSpec for a block whose index is constant over the entire grid."""
    index_map = lambda *_: (0,) * len(shape)
    if _buffered_ok():
        return pl.BlockSpec(shape, index_map, pipeline_mode=pl.Buffered(1))
    return pl.BlockSpec(shape, index_map)


def _compiler_params(dimension_semantics):
    kwargs = dict(dimension_semantics=dimension_semantics)
    try:
        cap = int(pltpu.get_tpu_info().vmem_capacity_bytes)
        kwargs["vmem_limit_bytes"] = (3 * cap) // 4   # ~96 MiB v5e/v6e, ~48 MiB v7x
    except Exception:
        pass  # fall back to compiler default scoped-VMEM limit
    return pltpu.CompilerParams(**kwargs)


# ----------------------------------------------------------------------------
# Fused multi-head attention (+ residual + LayerNorm) kernel
# ----------------------------------------------------------------------------

def _mha_ln_kernel(*refs, n_heads, tq, causal, has_mask, return_kv):
    """Grid = (B, Tq//tq).  One (batch, query-tile) per step.

    inputs : xq [1, tq, D] bf16, xkv [1, Tk, D] bf16, optional mask [tq, Tk] f32,
             wq [D, D] bf16 (pre-scaled by 1/sqrt(dh)), bq [1, D] f32 (pre-scaled),
             wkv [D, 2D] bf16, bkv [1, 2D] f32, wo [D, D] bf16, bo [1, D] f32,
             gamma/beta [1, D] f32.
    outputs: y [1, tq, D] bf16 = LN(xq + MHA(xq, xkv)); optionally k, v [1, tq, D] bf16.
    scratch: ctx [tq, D] f32.
    """
    idx = 0
    xq_ref = refs[idx]; idx += 1
    xkv_ref = refs[idx]; idx += 1
    if has_mask:
        mask_ref = refs[idx]; idx += 1
    (wq_ref, bq_ref, wkv_ref, bkv_ref, wo_ref, bo_ref,
     g_ref, b_ref) = refs[idx:idx + 8]
    idx += 8
    y_ref = refs[idx]; idx += 1
    if return_kv:
        k_out_ref = refs[idx]; v_out_ref = refs[idx + 1]; idx += 2
    ctx_ref = refs[idx]

    xq = xq_ref[0]                        # [tq, D]  bf16
    xkv = xkv_ref[0]                      # [Tk, D]  bf16
    D = xq.shape[-1]
    Tk = xkv.shape[0]
    dh = D // n_heads

    # Projections: one Q matmul + one concatenated K|V matmul (bf16 MXU, f32 acc).
    q = jnp.dot(xq, wq_ref[...], preferred_element_type=jnp.float32) + bq_ref[...]
    kv = jnp.dot(xkv, wkv_ref[...], preferred_element_type=jnp.float32) + bkv_ref[...]
    k = kv[:, :D]
    v = kv[:, D:]

    if return_kv:
        # Each (b, i) grid step writes exactly its own tq-row slice of the KV cache.
        if tq == Tk:                      # single query tile covers the full sequence
            k_tile, v_tile = k, v
        else:                             # recompute just this tile's K/V from xq (== xkv rows)
            kv_tile = jnp.dot(xq, wkv_ref[...],
                              preferred_element_type=jnp.float32) + bkv_ref[...]
            k_tile, v_tile = kv_tile[:, :D], kv_tile[:, D:]
        k_out_ref[0] = k_tile.astype(k_out_ref.dtype)
        v_out_ref[0] = v_tile.astype(v_out_ref.dtype)

    # Additive mask (hoisted out of the head loop).
    if has_mask:
        mask = mask_ref[...]
    elif causal:
        row = jax.lax.broadcasted_iota(jnp.int32, (tq, Tk), 0) + pl.program_id(1) * tq
        col = jax.lax.broadcasted_iota(jnp.int32, (tq, Tk), 1)
        mask = jnp.where(row >= col, jnp.float32(0.0), jnp.float32(-1e9))
    else:
        mask = None

    qb = q.astype(jnp.bfloat16)
    kb = k.astype(jnp.bfloat16)
    vb = v.astype(jnp.bfloat16)

    # Per-head attention; each head's context is written straight into its lane
    # slice of the VMEM scratch (no list + concat, bounded vreg pressure).
    for h in range(n_heads):
        qh = qb[:, h * dh:(h + 1) * dh]                                   # [tq, dh]
        kh = kb[:, h * dh:(h + 1) * dh]                                   # [Tk, dh]
        vh = vb[:, h * dh:(h + 1) * dh]                                   # [Tk, dh]
        s = jax.lax.dot_general(qh, kh, (((1,), (1,)), ((), ())),
                                preferred_element_type=jnp.float32)        # [tq, Tk]
        if mask is not None:
            s = s + mask
        s = s - jnp.max(s, axis=-1, keepdims=True)
        p = jnp.exp(s)
        p = p * pl.reciprocal(jnp.sum(p, axis=-1, keepdims=True), approx=True)
        ctx_ref[:, h * dh:(h + 1) * dh] = jnp.dot(
            p.astype(jnp.bfloat16), vh, preferred_element_type=jnp.float32)

    attn = jnp.dot(ctx_ref[...].astype(jnp.bfloat16), wo_ref[...],
                   preferred_element_type=jnp.float32) + bo_ref[...]       # [tq, D]

    # Residual add + LayerNorm in f32.
    hres = xq.astype(jnp.float32) + attn
    mean = jnp.mean(hres, axis=-1, keepdims=True)
    var = jnp.mean((hres - mean) ** 2, axis=-1, keepdims=True)
    y = ((hres - mean) * jax.lax.rsqrt(var + 1e-5)) * g_ref[...] + b_ref[...]
    y_ref[0] = y.astype(y_ref.dtype)


def mha_ln(x_q, x_kv, p, ln_g, ln_b, n_heads, *, causal=False, mask=None,
           return_kv=False, out_dtype=jnp.bfloat16, kv_dtype=jnp.bfloat16):
    """Fused MHA + residual + LN.  x_q: [B, Tq, D] bf16, x_kv: [B, Tk, D] bf16."""
    B, Tq, D = x_q.shape
    Tk = x_kv.shape[1]
    if return_kv:
        assert Tq == Tk, "KV-cache output assumes self-attention (Tq == Tk)."

    tq = _pick_tile(Tq, _TQ_TARGET, 8)
    n_tq = Tq // tq
    has_mask = mask is not None

    kernel = partial(_mha_ln_kernel, n_heads=n_heads, tq=tq, causal=causal,
                     has_mask=has_mask, return_kv=return_kv)

    in_specs = [
        pl.BlockSpec((1, tq, D), lambda b, i: (b, i, 0)),   # x_q (residual input)
        pl.BlockSpec((1, Tk, D), lambda b, i: (b, 0, 0)),   # x_kv
    ]
    args = [x_q, x_kv]
    if has_mask:
        in_specs.append(pl.BlockSpec((tq, Tk), lambda b, i: (i, 0)))
        args.append(mask)
    in_specs += [
        _const_spec((D, D)),        # wq  (bf16, pre-scaled)
        _const_spec((1, D)),        # bq
        _const_spec((D, 2 * D)),    # wkv (bf16)
        _const_spec((1, 2 * D)),    # bkv
        _const_spec((D, D)),        # wo  (bf16)
        _const_spec((1, D)),        # bo
        _const_spec((1, D)),        # LN gamma
        _const_spec((1, D)),        # LN beta
    ]
    args += [p["wq"], p["bq"], p["wkv"], p["bkv"], p["wo"], p["bo"], ln_g, ln_b]

    y_shape = jax.ShapeDtypeStruct((B, Tq, D), out_dtype)
    y_spec = pl.BlockSpec((1, tq, D), lambda b, i: (b, i, 0))
    if return_kv:
        out_shape = (y_shape,
                     jax.ShapeDtypeStruct((B, Tk, D), kv_dtype),
                     jax.ShapeDtypeStruct((B, Tk, D), kv_dtype))
        out_specs = (y_spec,
                     pl.BlockSpec((1, tq, D), lambda b, i: (b, i, 0)),
                     pl.BlockSpec((1, tq, D), lambda b, i: (b, i, 0)))
    else:
        out_shape = y_shape
        out_specs = y_spec

    return pl.pallas_call(
        kernel,
        out_shape=out_shape,
        grid=(B, n_tq),
        in_specs=in_specs,
        out_specs=out_specs,
        scratch_shapes=[pltpu.VMEM((tq, D), jnp.float32)],   # per-head context
        compiler_params=_compiler_params(("parallel", "parallel")),
    )(*args)


# ----------------------------------------------------------------------------
# Fused FFN (+ residual + LayerNorm) kernel, hidden dim as a reduction axis
# ----------------------------------------------------------------------------

def _ffn_ln_kernel(x_ref, w1_ref, b1_ref, w2_ref, b2_ref, g_ref, b_ref,
                   o_ref, acc_ref):
    """Grid = (N//rows, H//th).  acc += relu(x @ w1_k + b1_k) @ w2_k over k."""
    k = pl.program_id(1)
    nk = pl.num_programs(1)

    @pl.when(k == 0)
    def _():
        acc_ref[...] = jnp.zeros_like(acc_ref)

    x = x_ref[...]                                                        # [rows, D] bf16
    h = jnp.dot(x, w1_ref[...], preferred_element_type=jnp.float32) + b1_ref[...]
    h = jnp.maximum(h, 0.0)
    acc_ref[...] += jnp.dot(h.astype(jnp.bfloat16), w2_ref[...],
                            preferred_element_type=jnp.float32)

    @pl.when(k == nk - 1)
    def _():
        y = x.astype(jnp.float32) + acc_ref[...] + b2_ref[...]
        mean = jnp.mean(y, axis=-1, keepdims=True)
        var = jnp.mean((y - mean) ** 2, axis=-1, keepdims=True)
        o_ref[...] = (((y - mean) * jax.lax.rsqrt(var + 1e-5))
                      * g_ref[...] + b_ref[...]).astype(o_ref.dtype)


def ffn_ln(x, w1, b1, w2, b2, ln_g, ln_b, *, out_dtype=jnp.bfloat16):
    """LN(x + Linear2(ReLU(Linear1(x)))).  x: [N, D] bf16; weights bf16, biases f32."""
    N, D = x.shape
    H = w1.shape[1]
    rows = _pick_tile(N, _FFN_ROW_TARGET, 8)
    th = _pick_tile(H, _FFN_HID_TARGET, 128)
    grid = (N // rows, H // th)

    return pl.pallas_call(
        _ffn_ln_kernel,
        out_shape=jax.ShapeDtypeStruct((N, D), out_dtype),
        grid=grid,
        in_specs=[
            pl.BlockSpec((rows, D), lambda i, k: (i, 0)),   # x (constant over k)
            pl.BlockSpec((D, th), lambda i, k: (0, k)),     # w1 hidden slab
            pl.BlockSpec((1, th), lambda i, k: (0, k)),     # b1 hidden slab
            pl.BlockSpec((th, D), lambda i, k: (k, 0)),     # w2 hidden slab
            _const_spec((1, D)),                            # b2
            _const_spec((1, D)),                            # LN gamma
            _const_spec((1, D)),                            # LN beta
        ],
        out_specs=pl.BlockSpec((rows, D), lambda i, k: (i, 0)),
        scratch_shapes=[pltpu.VMEM((rows, D), jnp.float32)],
        compiler_params=_compiler_params(("parallel", "arbitrary")),
    )(x, w1, b1, w2, b2, ln_g, ln_b)


# ----------------------------------------------------------------------------
# Model glue (plain JAX: embedding gather, PE add, layer loop, KV formatting)
# ----------------------------------------------------------------------------

def decoder_layer(x, enc, lp, n_heads, *, tgt_mask=None, tgt_causal=False,
                  src_mask=None):
    B, T, D = x.shape
    dh = D // n_heads

    # Self-attention + residual + LN1 (KV projections returned for the cache).
    x, k_self, v_self = mha_ln(x, x, lp["self_attn"], lp["ln1_g"], lp["ln1_b"],
                               n_heads, causal=tgt_causal, mask=tgt_mask,
                               return_kv=True)

    # Cross-attention + residual + LN2 (no KV outputs: they were discarded).
    x = mha_ln(x, enc, lp["cross_attn"], lp["ln2_g"], lp["ln2_b"], n_heads,
               causal=False, mask=src_mask, return_kv=False)

    # FFN + residual + LN3.
    x = ffn_ln(x.reshape(B * T, D), lp["ff_w1"], lp["ff_b1"], lp["ff_w2"],
               lp["ff_b2"], lp["ln3_g"], lp["ln3_b"]).reshape(B, T, D)

    # Format the returned KV cache to the [B, H, T, dh] API layout (bf16 transpose).
    kv = (k_self.reshape(B, T, n_heads, dh).transpose(0, 2, 1, 3),
          v_self.reshape(B, T, n_heads, dh).transpose(0, 2, 1, 3))
    return x, kv


def sinusoidal_pe(max_len, d_model):
    pos = jnp.arange(max_len, dtype=jnp.float32)[:, None]
    div = jnp.exp(
        jnp.arange(0, d_model, 2, dtype=jnp.float32) * (-math.log(10000.0) / d_model))
    pe = jnp.zeros((max_len, d_model), dtype=jnp.float32)
    pe = pe.at[:, 0::2].set(jnp.sin(pos * div))
    pe = pe.at[:, 1::2].set(jnp.cos(pos * div))
    return pe


def transformer_decoder_model(params, x_ids, encoder_output, tgt_mask=None,
                              src_mask=None, past_key_values=None,
                              return_attention=False, tgt_is_causal=False):
    """Forward pass mirroring TransformerDecoderModel.forward (return_attention=False).

    If `tgt_is_causal` and tgt_mask is None, the causal mask is generated inside
    the attention kernel (no [T,T] HBM operand); an explicit additive tgt_mask /
    src_mask array is also supported.
    """
    del past_key_values  # demo runs without cached KV (past_key_values=None)
    B, T = x_ids.shape
    D = params["embed"].shape[1]
    n_heads = params["n_heads"]

    # InputEmbedding: embed * sqrt(d_model) + positional encoding (+ dropout: identity).
    emb = jnp.take(params["embed"], x_ids, axis=0) * math.sqrt(D)
    h = (emb + params["pe"][:T][None, :, :]).astype(jnp.bfloat16)
    enc = encoder_output.astype(jnp.bfloat16)

    tgt_mask_arr = None if tgt_mask is None else tgt_mask.astype(jnp.float32)
    src_mask_arr = None if src_mask is None else src_mask.astype(jnp.float32)
    use_causal = tgt_is_causal and (tgt_mask is None)

    updated_past_key_values = []
    for lp in params["layers"]:
        h, kv = decoder_layer(h, enc, lp, n_heads, tgt_mask=tgt_mask_arr,
                              tgt_causal=use_causal, src_mask=src_mask_arr)
        updated_past_key_values.append(kv)

    return h.astype(jnp.float32), tuple(updated_past_key_values)


# ----------------------------------------------------------------------------
# Parameter init (PyTorch-style f32) + kernel packing (fused/scaled/bf16 weights)
# ----------------------------------------------------------------------------

def init_params(key, vocab_size, d_model, max_len, n_heads, hidden_ff_d, num_layers):
    keys = iter(jax.random.split(key, 8 + num_layers * 16))

    def dense(k, din, dout):
        return jax.random.normal(k, (din, dout), jnp.float32) * 0.02

    def mha_params():
        return {
            "wq": dense(next(keys), d_model, d_model), "bq": jnp.zeros((d_model,), jnp.float32),
            "wk": dense(next(keys), d_model, d_model), "bk": jnp.zeros((d_model,), jnp.float32),
            "wv": dense(next(keys), d_model, d_model), "bv": jnp.zeros((d_model,), jnp.float32),
            "wo": dense(next(keys), d_model, d_model), "bo": jnp.zeros((d_model,), jnp.float32),
        }

    layers = []
    for _ in range(num_layers):
        layers.append({
            "self_attn": mha_params(),
            "cross_attn": mha_params(),
            "ff_w1": dense(next(keys), d_model, hidden_ff_d),
            "ff_b1": jnp.zeros((hidden_ff_d,), jnp.float32),
            "ff_w2": dense(next(keys), hidden_ff_d, d_model),
            "ff_b2": jnp.zeros((d_model,), jnp.float32),
            "ln1_g": jnp.ones((d_model,), jnp.float32), "ln1_b": jnp.zeros((d_model,), jnp.float32),
            "ln2_g": jnp.ones((d_model,), jnp.float32), "ln2_b": jnp.zeros((d_model,), jnp.float32),
            "ln3_g": jnp.ones((d_model,), jnp.float32), "ln3_b": jnp.zeros((d_model,), jnp.float32),
        })

    return {
        "embed": jax.random.normal(next(keys), (vocab_size, d_model), jnp.float32) * 0.02,
        "pe": sinusoidal_pe(max_len, d_model),
        "layers": layers,
        "n_heads": n_heads,
    }


def pack_params(params):
    """One-time prep: fuse wk|wv, fold 1/sqrt(dh) into wq/bq, cast matmul weights to bf16."""
    n_heads = params["n_heads"]
    d_model = params["embed"].shape[1]
    dh = d_model // n_heads
    scale = 1.0 / math.sqrt(dh)

    def pack_mha(p):
        return {
            "wq": (p["wq"] * scale).astype(jnp.bfloat16),
            "bq": (p["bq"] * scale).reshape(1, -1).astype(jnp.float32),
            "wkv": jnp.concatenate([p["wk"], p["wv"]], axis=1).astype(jnp.bfloat16),
            "bkv": jnp.concatenate([p["bk"], p["bv"]]).reshape(1, -1).astype(jnp.float32),
            "wo": p["wo"].astype(jnp.bfloat16),
            "bo": p["bo"].reshape(1, -1).astype(jnp.float32),
        }

    layers = []
    for lp in params["layers"]:
        layers.append({
            "self_attn": pack_mha(lp["self_attn"]),
            "cross_attn": pack_mha(lp["cross_attn"]),
            "ff_w1": lp["ff_w1"].astype(jnp.bfloat16),
            "ff_b1": lp["ff_b1"].reshape(1, -1).astype(jnp.float32),
            "ff_w2": lp["ff_w2"].astype(jnp.bfloat16),
            "ff_b2": lp["ff_b2"].reshape(1, -1).astype(jnp.float32),
            "ln1_g": lp["ln1_g"].reshape(1, -1), "ln1_b": lp["ln1_b"].reshape(1, -1),
            "ln2_g": lp["ln2_g"].reshape(1, -1), "ln2_b": lp["ln2_b"].reshape(1, -1),
            "ln3_g": lp["ln3_g"].reshape(1, -1), "ln3_b": lp["ln3_b"].reshape(1, -1),
        })

    return {"embed": params["embed"], "pe": params["pe"], "layers": layers,
            "n_heads": n_heads}


# ----------------------------------------------------------------------------
# Demo
# ----------------------------------------------------------------------------

if __name__ == "__main__":
    vocab_size, d_model, max_len = 50, 32, 16
    n_heads, hidden_ff_d, num_layers = 4, 64, 2
    B, T, S = 2, 8, 8  # batch, target seq, source (encoder) seq

    key = jax.random.PRNGKey(0)
    kp, kx, ke = jax.random.split(key, 3)

    raw_params = init_params(kp, vocab_size, d_model, max_len, n_heads,
                             hidden_ff_d, num_layers)
    params = pack_params(raw_params)

    x_ids = jax.random.randint(kx, (B, T), 0, vocab_size, dtype=jnp.int32)
    encoder_output = jax.random.normal(ke, (B, S, d_model), jnp.float32)

    # Causal target mask is generated inside the attention kernel (tgt_is_causal=True).
    out, updated_past_key_values = transformer_decoder_model(
        params, x_ids, encoder_output, tgt_mask=None, src_mask=None,
        past_key_values=None, return_attention=False, tgt_is_causal=True)

    out = jax.block_until_ready(out)
    jax.block_until_ready(updated_past_key_values)

    assert out.shape == (B, T, d_model)
    assert out.dtype == jnp.float32
    assert len(updated_past_key_values) == num_layers
    assert updated_past_key_values[0][0].shape == (B, n_heads, T, d_model // n_heads)
    assert updated_past_key_values[0][1].shape == (B, n_heads, T, d_model // n_heads)
    assert bool(jnp.all(jnp.isfinite(out)))

    print("KERNEL_OK")
</pallas_src>

<mosaic_0001>
module attributes {stable_mosaic.version = 11 : i64} {
  func.func @_k(%arg0: i32, %arg1: memref<8x128xf32, #tpu.memory_space<vmem>>, %arg2: memref<8x128xf32, #tpu.memory_space<vmem>>) attributes {dimension_semantics = [#tpu.dimension_semantics<arbitrary>], iteration_bounds = array<i64: 2>, scalar_prefetch = 0 : i64, scratch_operands = 0 : i64, tpu.core_type = #tpu.core_type<tc>, window_params = [{pipeline_mode = #tpu.pipeline_mode<synchronous>, transform_indices = @transform_0, window_bounds = array<i64: 8, 128>}, {transform_indices = @transform_1, window_bounds = array<i64: 8, 128>}]} {
    %c0 = arith.constant 0 : index
    %c0_0 = arith.constant 0 : index
    %0 = vector.load %arg1[%c0, %c0_0] : memref<8x128xf32, #tpu.memory_space<vmem>>, vector<8x128xf32>
    %cst = arith.constant 2.000000e+00 : f32
    %1 = vector.broadcast %cst : f32 to vector<8x128xf32>
    %2 = arith.mulf %0, %1 : vector<8x128xf32>
    %c0_1 = arith.constant 0 : index
    %c0_2 = arith.constant 0 : index
    %3 = vector.load %arg2[%c0_1, %c0_2] : memref<8x128xf32, #tpu.memory_space<vmem>>, vector<8x128xf32>
    tpu.vector_store %arg2[%c0_1, %c0_2], %2 {strides = array<i32>} : memref<8x128xf32, #tpu.memory_space<vmem>>, vector<8x128xf32>,
    return
  }
  func.func @transform_0(%arg0: i32) -> (i32, i32) {
    %c0_i32 = arith.constant 0 : i32
    %c0_i32_0 = arith.constant 0 : i32
    %c0_i32_1 = arith.constant 0 : i32
    return %c0_i32, %c0_i32_0 : i32, i32
  }
  func.func @transform_1(%arg0: i32) -> (i32, i32) {
    %c0_i32 = arith.constant 0 : i32
    %c0_i32_0 = arith.constant 0 : i32
    return %arg0, %c0_i32 : i32, i32
  }
}

module attributes {stable_mosaic.version = 11 : i64} {
  func.func @_mha_ln_kernel(%arg0: i32, %arg1: i32, %arg2: memref<1x8x32xbf16, #tpu.memory_space<vmem>>, %arg3: memref<1x8x32xbf16, #tpu.memory_space<vmem>>, %arg4: memref<32x32xbf16, #tpu.memory_space<vmem>>, %arg5: memref<1x32xf32, #tpu.memory_space<vmem>>, %arg6: memref<32x64xbf16, #tpu.memory_space<vmem>>, %arg7: memref<1x64xf32, #tpu.memory_space<vmem>>, %arg8: memref<32x32xbf16, #tpu.memory_space<vmem>>, %arg9: memref<1x32xf32, #tpu.memory_space<vmem>>, %arg10: memref<1x32xf32, #tpu.memory_space<vmem>>, %arg11: memref<1x32xf32, #tpu.memory_space<vmem>>, %arg12: memref<1x8x32xbf16, #tpu.memory_space<vmem>>, %arg13: memref<1x8x32xbf16, #tpu.memory_space<vmem>>, %arg14: memref<1x8x32xbf16, #tpu.memory_space<vmem>>, %arg15: memref<8x32xf32, #tpu.memory_space<vmem>>) attributes {dimension_semantics = [#tpu.dimension_semantics<parallel>, #tpu.dimension_semantics<parallel>], iteration_bounds = array<i64: 2, 1>, scalar_prefetch = 0 : i64, scratch_operands = 1 : i64, tpu.core_type = #tpu.core_type<tc>, window_params = [{transform_indices = @transform_0, window_bounds = array<i64: 1, 8, 32>}, {transform_indices = @transform_1, window_bounds = array<i64: 1, 8, 32>}, {pipeline_mode = #tpu.pipeline_mode<synchronous>, transform_indices = @transform_2, window_bounds = array<i64: 32, 32>}, {pipeline_mode = #tpu.pipeline_mode<synchronous>, transform_indices = @transform_3, window_bounds = array<i64: 1, 32>}, {pipeline_mode = #tpu.pipeline_mode<synchronous>, transform_indices = @transform_4, window_bounds = array<i64: 32, 64>}, {pipeline_mode = #tpu.pipeline_mode<synchronous>, transform_indices = @transform_5, window_bounds = array<i64: 1, 64>}, {pipeline_mode = #tpu.pipeline_mode<synchronous>, transform_indices = @transform_6, window_bounds = array<i64: 32, 32>}, {pipeline_mode = #tpu.pipeline_mode<synchronous>, transform_indices = @transform_7, window_bounds = array<i64: 1, 32>}, {pipeline_mode = #tpu.pipeline_mode<synchronous>, transform_indices = @transform_8, window_bounds = array<i64: 1, 32>}, {pipeline_mode = #tpu.pipeline_mode<synchronous>, transform_indices = @transform_9, window_bounds = array<i64: 1, 32>}, {transform_indices = @transform_10, window_bounds = array<i64: 1, 8, 32>}, {transform_indices = @transform_11, window_bounds = array<i64: 1, 8, 32>}, {transform_indices = @transform_12, window_bounds = array<i64: 1, 8, 32>}]} {
    %c0 = arith.constant 0 : index
    %c0_0 = arith.constant 0 : index
    %c0_1 = arith.constant 0 : index
    %0 = vector.load %arg2[%c0, %c0_0, %c0_1] : memref<1x8x32xbf16, #tpu.memory_space<vmem>>, vector<1x8x32xbf16>
    %1 = vector.shape_cast %0 : vector<1x8x32xbf16> to vector<8x32xbf16>
    %c0_2 = arith.constant 0 : index
    %c0_3 = arith.constant 0 : index
    %c0_4 = arith.constant 0 : index
    %2 = vector.load %arg3[%c0_2, %c0_3, %c0_4] : memref<1x8x32xbf16, #tpu.memory_space<vmem>>, vector<1x8x32xbf16>
    %3 = vector.shape_cast %2 : vector<1x8x32xbf16> to vector<8x32xbf16>
    %c0_5 = arith.constant 0 : index
    %c0_6 = arith.constant 0 : index
    %4 = vector.load %arg4[%c0_5, %c0_6] : memref<32x32xbf16, #tpu.memory_space<vmem>>, vector<32x32xbf16>
    %cst = arith.constant dense<0.000000e+00> : vector<8x32xf32>
    %5 = tpu.matmul %1, %4, %cst {dimension_numbers = #tpu.dot_dimension_numbers<[1], [0], [0], [1], [0, 0, 1, 1], [], []>} : vector<8x32xbf16>, vector<32x32xbf16>, vector<8x32xf32> -> vector<8x32xf32>
    %c0_7 = arith.constant 0 : index
    %c0_8 = arith.constant 0 : index
    %6 = vector.load %arg5[%c0_7, %c0_8] : memref<1x32xf32, #tpu.memory_space<vmem>>, vector<1x32xf32>
    %7 = vector.broadcast %6 : vector<1x32xf32> to vector<8x32xf32>
    %8 = arith.addf %5, %7 : vector<8x32xf32>
    %c0_9 = arith.constant 0 : index
    %c0_10 = arith.constant 0 : index
    %9 = vector.load %arg6[%c0_9, %c0_10] : memref<32x64xbf16, #tpu.memory_space<vmem>>, vector<32x64xbf16>
    %cst_11 = arith.constant dense<0.000000e+00> : vector<8x64xf32>
    %10 = tpu.matmul %3, %9, %cst_11 {dimension_numbers = #tpu.dot_dimension_numbers<[1], [0], [0], [1], [0, 0, 1, 1], [], []>} : vector<8x32xbf16>, vector<32x64xbf16>, vector<8x64xf32> -> vector<8x64xf32>
    %c0_12 = arith.constant 0 : index
    %c0_13 = arith.constant 0 : index
    %11 = vector.load %arg7[%c0_12, %c0_13] : memref<1x64xf32, #tpu.memory_space<vmem>>, vector<1x64xf32>
    %12 = vector.broadcast %11 : vector<1x64xf32> to vector<8x64xf32>
    %13 = arith.addf %10, %12 : vector<8x64xf32>
    %14 = vector.extract_strided_slice %13 {offsets = [0, 0], sizes = [8, 32], strides = [1, 1]} : vector<8x64xf32> to vector<8x32xf32>
    %15 = vector.extract_strided_slice %13 {offsets = [0, 32], sizes = [8, 32], strides = [1, 1]} : vector<8x64xf32> to vector<8x32xf32>
    %16 = arith.truncf %14 : vector<8x32xf32> to vector<8x32xbf16>
    %c0_14 = arith.constant 0 : index
    %c0_15 = arith.constant 0 : index
    %c0_16 = arith.constant 0 : index
    %17 = vector.load %arg13[%c0_14, %c0_15, %c0_16] : memref<1x8x32xbf16, #tpu.memory_space<vmem>>, vector<1x8x32xbf16>
    %18 = vector.shape_cast %17 : vector<1x8x32xbf16> to vector<8x32xbf16>
    %19 = vector.shape_cast %16 : vector<8x32xbf16> to vector<1x8x32xbf16>
    tpu.vector_store %arg13[%c0_14, %c0_15, %c0_16], %19 {strides = array<i32>} : memref<1x8x32xbf16, #tpu.memory_space<vmem>>, vector<1x8x32xbf16>,
    %20 = arith.truncf %15 : vector<8x32xf32> to vector<8x32xbf16>
    %c0_17 = arith.constant 0 : index
    %c0_18 = arith.constant 0 : index
    %c0_19 = arith.constant 0 : index
    %21 = vector.load %arg14[%c0_17, %c0_18, %c0_19] : memref<1x8x32xbf16, #tpu.memory_space<vmem>>, vector<1x8x32xbf16>
    %22 = vector.shape_cast %21 : vector<1x8x32xbf16> to vector<8x32xbf16>
    %23 = vector.shape_cast %20 : vector<8x32xbf16> to vector<1x8x32xbf16>
    tpu.vector_store %arg14[%c0_17, %c0_18, %c0_19], %23 {strides = array<i32>} : memref<1x8x32xbf16, #tpu.memory_space<vmem>>, vector<1x8x32xbf16>,
    %24 = tpu.iota {dimensions = array<i32: 0>} : vector<8x8xi32>
    %c8_i32 = arith.constant 8 : i32
    %25 = arith.muli %arg1, %c8_i32 : i32
    %26 = vector.broadcast %25 : i32 to vector<8x8xi32>
    %27 = arith.addi %24, %26 : vector<8x8xi32>
    %28 = tpu.iota {dimensions = array<i32: 1>} : vector<8x8xi32>
    %29 = arith.cmpi sge, %27, %28 : vector<8x8xi32>
    %cst_20 = arith.constant 0.000000e+00 : f32
    %cst_21 = arith.constant -1.000000e+09 : f32
    %30 = vector.broadcast %cst_20 : f32 to vector<8x8xf32>
    %31 = vector.broadcast %cst_21 : f32 to vector<8x8xf32>
    %32 = arith.select %29, %30, %31 : vector<8x8xi1>, vector<8x8xf32>
    %33 = arith.truncf %8 : vector<8x32xf32> to vector<8x32xbf16>
    %34 = arith.truncf %14 : vector<8x32xf32> to vector<8x32xbf16>
    %35 = arith.truncf %15 : vector<8x32xf32> to vector<8x32xbf16>
    %36 = vector.extract_strided_slice %33 {offsets = [0, 0], sizes = [8, 8], strides = [1, 1]} : vector<8x32xbf16> to vector<8x8xbf16>
    %37 = vector.extract_strided_slice %34 {offsets = [0, 0], sizes = [8, 8], strides = [1, 1]} : vector<8x32xbf16> to vector<8x8xbf16>
    %38 = vector.extract_strided_slice %35 {offsets = [0, 0], sizes = [8, 8], strides = [1, 1]} : vector<8x32xbf16> to vector<8x8xbf16>
    %cst_22 = arith.constant dense<0.000000e+00> : vector<8x8xf32>
    %39 = tpu.matmul %36, %37, %cst_22 {dimension_numbers = #tpu.dot_dimension_numbers<[1], [1], [0], [0], [0, 0, 1, 0], [], []>} : vector<8x8xbf16>, vector<8x8xbf16>, vector<8x8xf32> -> vector<8x8xf32>
    %40 = arith.addf %39, %32 : vector<8x8xf32>
    %cst_23 = arith.constant dense<0xFF800000> : vector<8xf32>
    %41 = vector.multi_reduction <maximumf>, %40, %cst_23 [1] : vector<8x8xf32> to vector<8xf32>
    %42 = vector.shape_cast %41 : vector<8xf32> to vector<8x1xf32>
    %43 = vector.broadcast %42 : vector<8x1xf32> to vector<8x8xf32>
    %44 = arith.subf %40, %43 : vector<8x8xf32>
    %45 = math.exp %44 : vector<8x8xf32>
    %cst_24 = arith.constant dense<0.000000e+00> : vector<8xf32>
    %46 = vector.multi_reduction <add>, %45, %cst_24 [1] : vector<8x8xf32> to vector<8xf32>
    %47 = vector.shape_cast %46 : vector<8xf32> to vector<8x1xf32>
    %48 = tpu.reciprocal %47 {approx = true} : vector<8x1xf32> -> vector<8x1xf32>
    %49 = vector.broadcast %48 : vector<8x1xf32> to vector<8x8xf32>
    %50 = arith.mulf %45, %49 : vector<8x8xf32>
    %51 = arith.truncf %50 : vector<8x8xf32> to vector<8x8xbf16>
    %cst_25 = arith.constant dense<0.000000e+00> : vector<8x8xf32>
    %52 = tpu.matmul %51, %38, %cst_25 {dimension_numbers = #tpu.dot_dimension_numbers<[1], [0], [0], [1], [0, 0, 1, 1], [], []>} : vector<8x8xbf16>, vector<8x8xbf16>, vector<8x8xf32> -> vector<8x8xf32>
    %c0_26 = arith.constant 0 : index
    %c0_27 = arith.constant 0 : index
    %53 = vector.load %arg15[%c0_26, %c0_27] : memref<8x32xf32, #tpu.memory_space<vmem>>, vector<8x8xf32>
    tpu.vector_store %arg15[%c0_26, %c0_27], %52 {strides = array<i32>} : memref<8x32xf32, #tpu.memory_space<vmem>>, vector<8x8xf32>,
    %54 = vector.extract_strided_slice %33 {offsets = [0, 8], sizes = [8, 8], strides = [1, 1]} : vector<8x32xbf16> to vector<8x8xbf16>
    %55 = vector.extract_strided_slice %34 {offsets = [0, 8], sizes = [8, 8], strides = [1, 1]} : vector<8x32xbf16> to vector<8x8xbf16>
    %56 = vector.extract_strided_slice %35 {offsets = [0, 8], sizes = [8, 8], strides = [1, 1]} : vector<8x32xbf16> to vector<8x8xbf16>
    %cst_28 = arith.constant dense<0.000000e+00> : vector<8x8xf32>
    %57 = tpu.matmul %54, %55, %cst_28 {dimension_numbers = #tpu.dot_dimension_numbers<[1], [1], [0], [0], [0, 0, 1, 0], [], []>} : vector<8x8xbf16>, vector<8x8xbf16>, vector<8x8xf32> -> vector<8x8xf32>
    %58 = arith.addf %57, %32 : vector<8x8xf32>
    %cst_29 = arith.constant dense<0xFF800000> : vector<8xf32>
    %59 = vector.multi_reduction <maximumf>, %58, %cst_29 [1] : vector<8x8xf32> to vector<8xf32>
    %60 = vector.shape_cast %59 : vector<8xf32> to vector<8x1xf32>
    %61 = vector.broadcast %60 : vector<8x1xf32> to vector<8x8xf32>
    %62 = arith.subf %58, %61 : vector<8x8xf32>
    %63 = math.exp %62 : vector<8x8xf32>
    %cst_30 = arith.constant dense<0.000000e+00> : vector<8xf32>
    %64 = vector.multi_reduction <add>, %63, %cst_30 [1] : vector<8x8xf32> to vector<8xf32>
    %65 = vector.shape_cast %64 : vector<8xf32> to vector<8x1xf32>
    %66 = tpu.reciprocal %65 {approx = true} : vector<8x1xf32> -> vector<8x1xf32>
    %67 = vector.broadcast %66 : vector<8x1xf32> to vector<8x8xf32>
    %68 = arith.mulf %63, %67 : vector<8x8xf32>
    %69 = arith.truncf %68 : vector<8x8xf32> to vector<8x8xbf16>
    %cst_31 = arith.constant dense<0.000000e+00> : vector<8x8xf32>
    %70 = tpu.matmul %69, %56, %cst_31 {dimension_numbers = #tpu.dot_dimension_numbers<[1], [0], [0], [1], [0, 0, 1, 1], [], []>} : vector<8x8xbf16>, vector<8x8xbf16>, vector<8x8xf32> -> vector<8x8xf32>
    %c0_32 = arith.constant 0 : index
    %c8 = arith.constant 8 : index
    %71 = vector.load %arg15[%c0_32, %c8] : memref<8x32xf32, #tpu.memory_space<vmem>>, vector<8x8xf32>
    tpu.vector_store %arg15[%c0_32, %c8], %70 {strides = array<i32>} : memref<8x32xf32, #tpu.memory_space<vmem>>, vector<8x8xf32>,
    %72 = vector.extract_strided_slice %33 {offsets = [0, 16], sizes = [8, 8], strides = [1, 1]} : vector<8x32xbf16> to vector<8x8xbf16>
    %73 = vector.extract_strided_slice %34 {offsets = [0, 16], sizes = [8, 8], strides = [1, 1]} : vector<8x32xbf16> to vector<8x8xbf16>
    %74 = vector.extract_strided_slice %35 {offsets = [0, 16], sizes = [8, 8], strides = [1, 1]} : vector<8x32xbf16> to vector<8x8xbf16>
    %cst_33 = arith.constant dense<0.000000e+00> : vector<8x8xf32>
    %75 = tpu.matmul %72, %73, %cst_33 {dimension_numbers = #tpu.dot_dimension_numbers<[1], [1], [0], [0], [0, 0, 1, 0], [], []>} : vector<8x8xbf16>, vector<8x8xbf16>, vector<8x8xf32> -> vector<8x8xf32>
    %76 = arith.addf %75, %32 : vector<8x8xf32>
    %cst_34 = arith.constant dense<0xFF800000> : vector<8xf32>
    %77 = vector.multi_reduction <maximumf>, %76, %cst_34 [1] : vector<8x8xf32> to vector<8xf32>
    %78 = vector.shape_cast %77 : vector<8xf32> to vector<8x1xf32>
    %79 = vector.broadcast %78 : vector<8x1xf32> to vector<8x8xf32>
    %80 = arith.subf %76, %79 : vector<8x8xf32>
    %81 = math.exp %80 : vector<8x8xf32>
    %cst_35 = arith.constant dense<0.000000e+00> : vector<8xf32>
    %82 = vector.multi_reduction <add>, %81, %cst_35 [1] : vector<8x8xf32> to vector<8xf32>
    %83 = vector.shape_cast %82 : vector<8xf32> to vector<8x1xf32>
    %84 = tpu.reciprocal %83 {approx = true} : vector<8x1xf32> -> vector<8x1xf32>
    %85 = vector.broadcast %84 : vector<8x1xf32> to vector<8x8xf32>
    %86 = arith.mulf %81, %85 : vector<8x8xf32>
    %87 = arith.truncf %86 : vector<8x8xf32> to vector<8x8xbf16>
    %cst_36 = arith.constant dense<0.000000e+00> : vector<8x8xf32>
    %88 = tpu.matmul %87, %74, %cst_36 {dimension_numbers = #tpu.dot_dimension_numbers<[1], [0], [0], [1], [0, 0, 1, 1], [], []>} : vector<8x8xbf16>, vector<8x8xbf16>, vector<8x8xf32> -> vector<8x8xf32>
    %c0_37 = arith.constant 0 : index
    %c16 = arith.constant 16 : index
    %89 = vector.load %arg15[%c0_37, %c16] : memref<8x32xf32, #tpu.memory_space<vmem>>, vector<8x8xf32>
    tpu.vector_store %arg15[%c0_37, %c16], %88 {strides = array<i32>} : memref<8x32xf32, #tpu.memory_space<vmem>>, vector<8x8xf32>,
    %90 = vector.extract_strided_slice %33 {offsets = [0, 24], sizes = [8, 8], strides = [1, 1]} : vector<8x32xbf16> to vector<8x8xbf16>
    %91 = vector.extract_strided_slice %34 {offsets = [0, 24], sizes = [8, 8], strides = [1, 1]} : vector<8x32xbf16> to vector<8x8xbf16>
    %92 = vector.extract_strided_slice %35 {offsets = [0, 24], sizes = [8, 8], strides = [1, 1]} : vector<8x32xbf16> to vector<8x8xbf16>
    %cst_38 = arith.constant dense<0.000000e+00> : vector<8x8xf32>
    %93 = tpu.matmul %90, %91, %cst_38 {dimension_numbers = #tpu.dot_dimension_numbers<[1], [1], [0], [0], [0, 0, 1, 0], [], []>} : vector<8x8xbf16>, vector<8x8xbf16>, vector<8x8xf32> -> vector<8x8xf32>
    %94 = arith.addf %93, %32 : vector<8x8xf32>
    %cst_39 = arith.constant dense<0xFF800000> : vector<8xf32>
    %95 = vector.multi_reduction <maximumf>, %94, %cst_39 [1] : vector<8x8xf32> to vector<8xf32>
    %96 = vector.shape_cast %95 : vector<8xf32> to vector<8x1xf32>
    %97 = vector.broadcast %96 : vector<8x1xf32> to vector<8x8xf32>
    %98 = arith.subf %94, %97 : vector<8x8xf32>
    %99 = math.exp %98 : vector<8x8xf32>
    %cst_40 = arith.constant dense<0.000000e+00> : vector<8xf32>
    %100 = vector.multi_reduction <add>, %99, %cst_40 [1] : vector<8x8xf32> to vector<8xf32>
    %101 = vector.shape_cast %100 : vector<8xf32> to vector<8x1xf32>
    %102 = tpu.reciprocal %101 {approx = true} : vector<8x1xf32> -> vector<8x1xf32>
    %103 = vector.broadcast %102 : vector<8x1xf32> to vector<8x8xf32>
    %104 = arith.mulf %99, %103 : vector<8x8xf32>
    %105 = arith.truncf %104 : vector<8x8xf32> to vector<8x8xbf16>
    %cst_41 = arith.constant dense<0.000000e+00> : vector<8x8xf32>
    %106 = tpu.matmul %105, %92, %cst_41 {dimension_numbers = #tpu.dot_dimension_numbers<[1], [0], [0], [1], [0, 0, 1, 1], [], []>} : vector<8x8xbf16>, vector<8x8xbf16>, vector<8x8xf32> -> vector<8x8xf32>
    %c0_42 = arith.constant 0 : index
    %c24 = arith.constant 24 : index
    %107 = vector.load %arg15[%c0_42, %c24] : memref<8x32xf32, #tpu.memory_space<vmem>>, vector<8x8xf32>
    tpu.vector_store %arg15[%c0_42, %c24], %106 {strides = array<i32>} : memref<8x32xf32, #tpu.memory_space<vmem>>, vector<8x8xf32>,
    %c0_43 = arith.constant 0 : index
    %c0_44 = arith.constant 0 : index
    %108 = vector.load %arg15[%c0_43, %c0_44] : memref<8x32xf32, #tpu.memory_space<vmem>>, vector<8x32xf32>
    %109 = arith.truncf %108 : vector<8x32xf32> to vector<8x32xbf16>
    %c0_45 = arith.constant 0 : index
    %c0_46 = arith.constant 0 : index
    %110 = vector.load %arg8[%c0_45, %c0_46] : memref<32x32xbf16, #tpu.memory_space<vmem>>, vector<32x32xbf16>
    %cst_47 = arith.constant dense<0.000000e+00> : vector<8x32xf32>
    %111 = tpu.matmul %109, %110, %cst_47 {dimension_numbers = #tpu.dot_dimension_numbers<[1], [0], [0], [1], [0, 0, 1, 1], [], []>} : vector<8x32xbf16>, vector<32x32xbf16>, vector<8x32xf32> -> vector<8x32xf32>
    %c0_48 = arith.constant 0 : index
    %c0_49 = arith.constant 0 : index
    %112 = vector.load %arg9[%c0_48, %c0_49] : memref<1x32xf32, #tpu.memory_space<vmem>>, vector<1x32xf32>
    %113 = vector.broadcast %112 : vector<1x32xf32> to vector<8x32xf32>
    %114 = arith.addf %111, %113 : vector<8x32xf32>
    %115 = arith.extf %1 : vector<8x32xbf16> to vector<8x32xf32>
    %116 = arith.addf %115, %114 : vector<8x32xf32>
    %cst_50 = arith.constant dense<0.000000e+00> : vector<8xf32>
    %117 = vector.multi_reduction <add>, %116, %cst_50 [1] : vector<8x32xf32> to vector<8xf32>
    %118 = vector.shape_cast %117 : vector<8xf32> to vector<8x1xf32>
    %cst_51 = arith.constant 3.200000e+01 : f32
    %119 = vector.broadcast %cst_51 : f32 to vector<8x1xf32>
    %120 = arith.divf %118, %119 : vector<8x1xf32>
    %121 = vector.broadcast %120 : vector<8x1xf32> to vector<8x32xf32>
    %122 = arith.subf %116, %121 : vector<8x32xf32>
    %123 = arith.mulf %122, %122 : vector<8x32xf32>
    %cst_52 = arith.constant dense<0.000000e+00> : vector<8xf32>
    %124 = vector.multi_reduction <add>, %123, %cst_52 [1] : vector<8x32xf32> to vector<8xf32>
    %125 = vector.shape_cast %124 : vector<8xf32> to vector<8x1xf32>
    %cst_53 = arith.constant 3.200000e+01 : f32
    %126 = vector.broadcast %cst_53 : f32 to vector<8x1xf32>
    %127 = arith.divf %125, %126 : vector<8x1xf32>
    %128 = vector.broadcast %120 : vector<8x1xf32> to vector<8x32xf32>
    %129 = arith.subf %116, %128 : vector<8x32xf32>
    %cst_54 = arith.constant 9.99999974E-6 : f32
    %130 = vector.broadcast %cst_54 : f32 to vector<8x1xf32>
    %131 = arith.addf %127, %130 : vector<8x1xf32>
    %132 = math.rsqrt %131 : vector<8x1xf32>
    %133 = vector.broadcast %132 : vector<8x1xf32> to vector<8x32xf32>
    %134 = arith.mulf %129, %133 : vector<8x32xf32>
    %c0_55 = arith.constant 0 : index
    %c0_56 = arith.constant 0 : index
    %135 = vector.load %arg10[%c0_55, %c0_56] : memref<1x32xf32, #tpu.memory_space<vmem>>, vector<1x32xf32>
    %136 = vector.broadcast %135 : vector<1x32xf32> to vector<8x32xf32>
    %137 = arith.mulf %134, %136 : vector<8x32xf32>
    %c0_57 = arith.constant 0 : index
    %c0_58 = arith.constant 0 : index
    %138 = vector.load %arg11[%c0_57, %c0_58] : memref<1x32xf32, #tpu.memory_space<vmem>>, vector<1x32xf32>
    %139 = vector.broadcast %138 : vector<1x32xf32> to vector<8x32xf32>
    %140 = arith.addf %137, %139 : vector<8x32xf32>
    %141 = arith.truncf %140 : vector<8x32xf32> to vector<8x32xbf16>
    %c0_59 = arith.constant 0 : index
    %c0_60 = arith.constant 0 : index
    %c0_61 = arith.constant 0 : index
    %142 = vector.load %arg12[%c0_59, %c0_60, %c0_61] : memref<1x8x32xbf16, #tpu.memory_space<vmem>>, vector<1x8x32xbf16>
    %143 = vector.shape_cast %142 : vector<1x8x32xbf16> to vector<8x32xbf16>
    %144 = vector.shape_cast %141 : vector<8x32xbf16> to vector<1x8x32xbf16>
    tpu.vector_store %arg12[%c0_59, %c0_60, %c0_61], %144 {strides = array<i32>} : memref<1x8x32xbf16, #tpu.memory_space<vmem>>, vector<1x8x32xbf16>,
    return
  }
  func.func @transform_0(%arg0: i32, %arg1: i32) -> (i32, i32, i32) {
    %c0_i32 = arith.constant 0 : i32
    %c0_i32_0 = arith.constant 0 : i32
    return %arg0, %arg1, %c0_i32 : i32, i32, i32
  }
  func.func @transform_1(%arg0: i32, %arg1: i32) -> (i32, i32, i32) {
    %c0_i32 = arith.constant 0 : i32
    %c0_i32_0 = arith.constant 0 : i32
    %c0_i32_1 = arith.constant 0 : i32
    return %arg0, %c0_i32, %c0_i32_0 : i32, i32, i32
  }
  func.func @transform_2(%arg0: i32, %arg1: i32) -> (i32, i32) {
    %c0_i32 = arith.constant 0 : i32
    %c0_i32_0 = arith.constant 0 : i32
    %c0_i32_1 = arith.constant 0 : i32
    return %c0_i32, %c0_i32_0 : i32, i32
  }
  func.func @transform_3(%arg0: i32, %arg1: i32) -> (i32, i32) {
    %c0_i32 = arith.constant 0 : i32
    %c0_i32_0 = arith.constant 0 : i32
    %c0_i32_1 = arith.constant 0 : i32
    return %c0_i32, %c0_i32_0 : i32, i32
  }
  func.func @transform_4(%arg0: i32, %arg1: i32) -> (i32, i32) {
    %c0_i32 = arith.constant 0 : i32
    %c0_i32_0 = arith.constant 0 : i32
    %c0_i32_1 = arith.constant 0 : i32
    return %c0_i32, %c0_i32_0 : i32, i32
  }
  func.func @transform_5(%arg0: i32, %arg1: i32) -> (i32, i32) {
    %c0_i32 = arith.constant 0 : i32
    %c0_i32_0 = arith.constant 0 : i32
    %c0_i32_1 = arith.constant 0 : i32
    return %c0_i32, %c0_i32_0 : i32, i32
  }
  func.func @transform_6(%arg0: i32, %arg1: i32) -> (i32, i32) {
    %c0_i32 = arith.constant 0 : i32
    %c0_i32_0 = arith.constant 0 : i32
    %c0_i32_1 = arith.constant 0 : i32
    return %c0_i32, %c0_i32_0 : i32, i32
  }
  func.func @transform_7(%arg0: i32, %arg1: i32) -> (i32, i32) {
    %c0_i32 = arith.constant 0 : i32
    %c0_i32_0 = arith.constant 0 : i32
    %c0_i32_1 = arith.constant 0 : i32
    return %c0_i32, %c0_i32_0 : i32, i32
  }
  func.func @transform_8(%arg0: i32, %arg1: i32) -> (i32, i32) {
    %c0_i32 = arith.constant 0 : i32
    %c0_i32_0 = arith.constant 0 : i32
    %c0_i32_1 = arith.constant 0 : i32
    return %c0_i32, %c0_i32_0 : i32, i32
  }
  func.func @transform_9(%arg0: i32, %arg1: i32) -> (i32, i32) {
    %c0_i32 = arith.constant 0 : i32
    %c0_i32_0 = arith.constant 0 : i32
    %c0_i32_1 = arith.constant 0 : i32
    return %c0_i32, %c0_i32_0 : i32, i32
  }
  func.func @transform_10(%arg0: i32, %arg1: i32) -> (i32, i32, i32) {
    %c0_i32 = arith.constant 0 : i32
    %c0_i32_0 = arith.constant 0 : i32
    return %arg0, %arg1, %c0_i32 : i32, i32, i32
  }
  func.func @transform_11(%arg0: i32, %arg1: i32) -> (i32, i32, i32) {
    %c0_i32 = arith.constant 0 : i32
    %c0_i32_0 = arith.constant 0 : i32
    return %arg0, %arg1, %c0_i32 : i32, i32, i32
  }
  func.func @transform_12(%arg0: i32, %arg1: i32) -> (i32, i32, i32) {
    %c0_i32 = arith.constant 0 : i32
    %c0_i32_0 = arith.constant 0 : i32
    return %arg0, %arg1, %c0_i32 : i32, i32, i32
  }
}

</mosaic_0001>

<bundles_post_ra>
// kernel: tpu_custom_call.1
= control target key start
LH: loop header
LB: loop body
LE: loop exit
PB: predicated region body
PF: predicated region fallthrough
CT: control target
= control target key end

     0   :  { %6 = vsyncpa [#allocation3], 0  ;;  %s482_s0 = inlined_call_operand.hbm [shape: f32[8,128], index: 0, kind: input, shape index: {}]   ;;  %s483_s1 = inlined_call_operand.hbm [shape: f32[16,128], index: 1, kind: output, shape index: {}]  }
   0x1   :  { %7 = vsyncpa [#allocation4], 0 }
   0x2   :  { %9 = vsyncpa [#allocation4 + $0x1], 0  ;;  %s352_s6 = smov 0   ;;  %s354_s7 = smov 0  }
   0x3   :  { %s356_s8 = smov 0   ;;  %s358_s9 = smov 0  }
   0x4 LB: > { %s373_s10 = sadd.s32 4294967295, %s338_s9   ;;  %s184_s11 = sadd.s32 4294967294, %s338_s9   ;;  %s338_s9 = sphi %s358_s9, %s499_s9   ;;  %s334_s8 = sphi %s356_s8, %s498_s8   ;;  %s330_s7 = sphi %s354_s7, %s497_s7   ;;  %s326_s6 = sphi %s352_s6, %s496_s6  }
   0x5   : > { %s377_s12 = sadd.s32 1, %s338_s9   ;;  %s43_s13 = sadd.s32 1, %s334_s8 }
   0x6   : > { %s40_s14 = ssub.s32 %s338_s9, %s377_s12  ;;  %p53_p0 = scmp.ne.s32.totalorder %s334_s8, %s330_s7 }
   0x7   : > { %p41_p1 = scmp.eq.s32.totalorder %s40_s14, 0  ;;  %p54_p2 = scmp.eq.s32.totalorder %s373_s10, 1 }
   0x8   : > { %p59_p3 = scmp.ne.s32.totalorder %s330_s7, %s326_s6  ;;  %p60_p4 = scmp.eq.s32.totalorder %s184_s11, 1 }
   0x9   : > { %s388_s15 = scalar_select %p41_p1, %s334_s8, %s43_s13  }
   0xa   : > { %p390_p5 = por %p54_p2, %p53_p0  ;;  %p394_p6 = por %p60_p4, %p59_p3 }
   0xb   : > { %p185_p7 = scmp.ge.s32.totalorder %s338_s9, 1  ;;  %p67_p8 = scmp.lt.s32.totalorder %s338_s9, 3 }
   0xc   : > { %s487_s16 = scalar_select %p390_p5, 1, 0 }
   0xd   : > { %s488_s17 = scalar_select %p394_p6, 1, 0 }
   0xe   : > { %p484_p9 = scmp.eq.s32.totalorder %s373_s10, 0  ;;  %p401_p10 = pnand %p185_p7, %p67_p8 }
   0xf   : > { %s340_s19 = smov [#allocation2]   ;;  %s244_s24 = scalar_lea.hbm %s482_s0, 128 }
  0x10   : > { %s489_s18 = scalar_select %p401_p10, 1, 0 }
  0x11   : > { %s80_s20 = sshll.u32 %s340_s19, 4  ;;  %p200_p11 = pneg %p401_p10  ;;  %s81_s20 = int_to_ptr.vmem [resolvable:$true] %s80_s20 }
  0x12   : > { %p245_p13 = scmp.ne.s32.totalorder %s482_s0, %s244_s24  ;;  %p251_p3 = scmp.lt.u32.totalorder %s244_s24, %s482_s0 }
  0x13   : > { %p409_p12 = pnand %p484_p9, %p200_p11 }
  0x15   : > { %p246_p0 = pneg %p409_p12 }
  0x17   : > { %p247_p1 = pnand %p246_p0, %p245_p13 }
  0x19   : > { %p248_p2 = pneg %p247_p1 }
  0x1b   : > { %p253_p4 = pnand %p251_p3, %p248_p2 }
  0x1d   : > { %256 = shalt.err (!%p253_p4)
}
  0x1e   : > { %s257_s29 = scalar_lea.vmem %s81_s20, 128  ;;  %p265_p9 = scmp.lt.s32.totalorder %s81_s20, %s81_s20 }
  0x1f   : > { %p258_p7 = scmp.ne.s32.totalorder %s81_s20, %s257_s29  ;;  %p266_p6 = scmp.lt.s32.totalorder %s257_s29, %s257_s29 }
  0x21   : > { %p260_p8 = pnand %p258_p7, %p246_p0  ;;  %p267_p5 = por %p266_p6, %p265_p9 }
  0x23   : > { %p261_p11 = pneg %p260_p8 }
  0x25   : > { %p268_p10 = pnand %p267_p5, %p261_p11 }
  0x27   : > { %271 = shalt.err (!%p268_p10)
}
  0x28   : > { %203 = dma.hbm_to_vmem [thread:$0]  (!%p409_p12), %s482_s0, 128, %s81_s20, [#allocation3]  }
  0x29   : > { %p491_p13 = scmp.ne.s32.totalorder %s489_s18, 0 }
  0x2a   : > { %p492_p1 = scmp.eq.s32.totalorder (!%p491_p13), %s373_s10, 0 }
  0x2b   : > { %93 = sbr.rel (%p491_p13) target bundleno = 77 (0x4d), region = 24 }
  0x32   : > { %317 = dma.done.wait (%p492_p1), [#allocation3], 128   ;;  %p493_p0 = pmov %p492_p1 }
  0x33   : > { %s105_s3 = sand.u32 1, %s330_s7   ;;  %s191_s13 = sshll.u32 %s373_s10, 7  ;;  %v108_v0 = vld [vmem:[#allocation2] sm:$0xff] }
  0x34   : > { %319 = vsyncadd (%p493_p0), [#allocation3], 4294967168  ;;  %s189_s4 = sshll.u32 %s105_s3, 3  ;;  %v109_v1 = vmul.f32 2.0, %v108_v0  ;;  %s442_s19 = scalar_lea.hbm %s483_s1, %s191_s13 }
  0x35   : > { %s107_s5 = scalar_lea.vmem [#allocation5], %s189_s4  ;;  %s112_s20 = scalar_lea.sflag [#allocation4], %s105_s3 }
  0x36   : > { %s125_s11 = sshll.u32 %s107_s5, 4  ;;  %110 = vst [vmem:[%s107_s5] sm:$0xff] %v109_v1  ;;  %p494_p6 = scmp.ne.s32.totalorder %s487_s16, 0  ;;  %s437_s11 = int_to_ptr.vmem [resolvable:$true] %s125_s11 }
  0x37   : > { %s272_s21 = scalar_lea.vmem %s437_s11, 128  ;;  %s341_s10 = smov [#allocation5]  }
  0x38   : > { %p273_p5 = scmp.ne.s32.totalorder %s437_s11, %s272_s21  ;;  %s276_s22 = sshll.u32 %s341_s10, 4  ;;  %s277_s22 = int_to_ptr.vmem [resolvable:$false] %s276_s22 }
  0x39   : > { %s278_s23 = scalar_lea.vmem %s277_s22, 256  ;;  %p279_p12 = scmp.lt.s32.totalorder %s437_s11, %s277_s22 }
  0x3a   : > { %p274_p9 = pnand %p273_p5, %p494_p6  ;;  %p280_p2 = scmp.lt.s32.totalorder %s278_s23, %s272_s21 }
  0x3c   : > { %p275_p10 = pneg %p274_p9  ;;  %p281_p3 = por %p280_p2, %p279_p12 }
  0x3e   : > { %p282_p4 = pnand %p281_p3, %p275_p10 }
  0x40   : > { %285 = shalt.err (!%p282_p4)
}
  0x41   : > { %s286_s24 = scalar_lea.hbm %s442_s19, 128  ;;  %s290_s27 = scalar_lea.hbm %s483_s1, 256 }
  0x42   : > { %p287_p7 = scmp.ne.s32.totalorder %s442_s19, %s286_s24  ;;  %p291_p13 = scmp.lt.u32.totalorder %s442_s19, %s483_s1 }
  0x43   : > { %p292_p1 = scmp.lt.u32.totalorder %s290_s27, %s286_s24  ;;  %p294_p5 = scmp.lt.u32.totalorder %s286_s24, %s442_s19 }
  0x44   : > { %p288_p8 = pnand %p287_p7, %p494_p6 }
  0x45   : > { %p293_p0 = por %p292_p1, %p291_p13 }
  0x46   : > { %p289_p11 = pneg %p288_p8 }
  0x47   : > { %p295_p9 = por %p294_p5, %p293_p0 }
  0x49   : > { %p296_p10 = pnand %p295_p9, %p289_p11 }
  0x4b   : > { %299 = shalt.err (!%p296_p10)
}
  0x4c   : > { %198 = dma.vmem_to_hbm [thread:$0]  (%p494_p6), %s437_s11, 128, %s442_s19, %s112_s20  }
  0x4d PF: > { %p210_p12 = scmp.ge.s32.totalorder %s338_s9, 2  ;;  %s137_s30 = sand.u32 1, %s326_s6  }
  0x4e   : > { %p495_p2 = scmp.ne.s32.totalorder %s488_s17, 0  ;;  %s138_s2 = scalar_lea.sflag [#allocation4], %s137_s30 }
  0x50   : > { %p205_p3 = pnand %p210_p12, %p495_p2 }
  0x52   : > { %321 = dma.done.wait (!%p205_p3), %s138_s2, 128  }
  0x53   : > { %323 = vsyncadd (!%p205_p3), %s138_s2, 4294967168  ;;  %p12_p4 = scmp.ge.s32.totalorder %s377_s12, 4   ;;  %s496_s6 = smov %s330_s7 }
  0x54   : > { %s497_s7 = smov %s334_s8  ;;  %s498_s8 = smov %s388_s15 }
  0x55   : > { %s499_s9 = smov %s377_s12  ;;  %14 = sbr.rel (!%p12_p4) target bundleno = 4 (0x4), region = 61 }
  0x5c   :  { %143 = vsyncpa [#allocation3], 1 }
  0x5d   :  { %145 = vsyncpa [#allocation3 + $0x1], 1 }
  0x5e   :  { %146 = vsyncpa [#allocation4], 1 }
  0x5f   :  { %148 = vsyncpa [#allocation4 + $0x1], 1 }

// kernel: tpu_custom_call.1
= control target key start
LH: loop header
LB: loop body
LE: loop exit
PB: predicated region body
PF: predicated region fallthrough
CT: control target
= control target key end

     0   :  { %s2606_s0 = inlined_call_operand.hbm [shape: bf16[2,8,32], index: 0, kind: input, shape index: {}]   ;;  %s2607_s1 = inlined_call_operand.hbm [shape: bf16[2,8,32], index: 1, kind: input, shape index: {}]   ;;  %s2608_s2 = inlined_call_operand.hbm [shape: bf16[32,32], index: 2, kind: input, shape index: {}]   ;;  %s2609_s3 = inlined_call_operand.vmem [shape: f32[1,32], index: 3, kind: input, shape index: {}]   ;;  %s2610_s4 = inlined_call_operand.hbm [shape: bf16[32,64], index: 4, kind: input, shape index: {}]   ;;  %s2611_s5 = inlined_call_operand.vmem [shape: f32[1,64], index: 5, kind: input, shape index: {}]   ;;  %s2612_s6 = inlined_call_operand.vmem [shape: bf16[32,32], index: 6, kind: input, shape index: {}]   ;;  %s2613_s7 = inlined_call_operand.vmem [shape: f32[1,32], index: 7, kind: input, shape index: {}]   ;;  %s2614_s8 = inlined_call_operand.vmem [shape: f32[1,32], index: 8, kind: input, shape index: {}]   ;;  %s2615_s9 = inlined_call_operand.vmem [shape: f32[1,32], index: 9, kind: input, shape index: {}]   ;;  %s2616_s10 = inlined_call_operand.hbm [shape: bf16[2,8,32], index: 10, kind: output, shape index: {0}]   ;;  %s2617_s11 = inlined_call_operand.hbm [shape: bf16[2,8,32], index: 11, kind: output, shape index: {1}]   ;;  %s2618_s12 = inlined_call_operand.hbm [shape: bf16[2,8,32], index: 12, kind: output, shape index: {2}]  }
   0x1   :  { %2630 = sst [smem:[#allocation26_spill]] %s2608_s2 }
   0x2   :  { %2631 = sst [smem:[#allocation27_spill]] %s2610_s4 }
   0x3   :  { %2632 = sst [smem:[#allocation28_spill]] %s2614_s8 }
   0x4   :  { %2633 = sst [smem:[#allocation29_spill]] %s2615_s9 }
   0x5   :  { %2634 = sst [smem:[#allocation30_spill]] %s2616_s10 }
   0x6   :  { %2635 = sst [smem:[#allocation31_spill]] %s2618_s12 }
   0x7   :  { %18 = vsyncpa [#allocation4], 0 }
   0x8   :  { %20 = vsyncpa [#allocation4 + $0x1], 0 }
   0x9   :  { %21 = vsyncpa [#allocation7], 0 }
   0xa   :  { %23 = vsyncpa [#allocation7 + $0x1], 0 }
   0xb   :  { %24 = vsyncpa [#allocation10], 0 }
   0xc   :  { %25 = vsyncpa [#allocation5], 0 }
   0xd   :  { %27 = vsyncpa [#allocation5 + $0x1], 0 }
   0xe   :  { %28 = vsyncpa [#allocation13], 0 }
   0xf   :  { %30 = vsyncpa [#allocation13 + $0x1], 0  ;;  %s2131_s21 = smov 0   ;;  %s2133_s22 = smov 0  }
  0x10   :  { %s2135_s23 = smov 0   ;;  %s2137_s24 = smov 0  }
  0x11   :  { %s2139_s25 = smov 0   ;;  %s2141_s26 = smov 0  }
  0x12 LB: > { %2636 = sst [smem:[#allocation21_spill]] %s2022_s21  ;;  %s2162_s27 = sadd.s32 4294967295, %s2042_s26   ;;  %s2042_s26 = sphi %s2141_s26, %s36_s26   ;;  %s2038_s25 = sphi %s2139_s25, %s2668_s25   ;;  %s2034_s24 = sphi %s2137_s24, %s2667_s24   ;;  %s2030_s23 = sphi %s2135_s23, %s2671_s23   ;;  %s2026_s22 = sphi %s2133_s22, %s2670_s22   ;;  %s2022_s21 = sphi %s2131_s21, %s2669_s21  }
  0x13   : > { %2637 = sst [smem:[#allocation22_spill]] %s2038_s25  ;;  %s2619_s28 = sadd.s32 4294967294, %s2042_s26  }
  0x14   : > { %p70_p0 = scmp.ne.s32.totalorder %s2026_s22, %s2022_s21  ;;  %p2623_p1 = scmp.eq.s32.totalorder %s2162_s27, 0 }
  0x15   : > { %p296_p3 = scmp.eq.s32.totalorder %s2619_s28, 1  ;;  %p1490_p5 = scmp.ge.s32.totalorder %s2042_s26, 1 }
  0x16   : > { %p2173_p4 = por %p2623_p1, %p70_p0  ;;  %p359_p7 = scmp.lt.s32.totalorder %s2042_s26, 3 }
  0x17   : > { %p2178_p6 = por %p296_p3, %p70_p0  ;;  %s2044_s14 = smov [#allocation8]  }
  0x18   : > { %s2638_s29 = scalar_select %p2173_p4, 1, 0 }
  0x19   : > { %s2639_s30 = scalar_select %p2178_p6, 1, 0 }
  0x1a   : > { %p2183_p8 = pnand %p1490_p5, %p359_p7  ;;  %s371_s15 = sshll.u32 %s2044_s14, 4  ;;  %s2187_s15 = int_to_ptr.vmem [resolvable:$true] %s371_s15 }
  0x1b   : > { %2640 = sst [smem:[#allocation23_spill]] %s2639_s30  ;;  %s2045_s17 = smov [#allocation9]  }
  0x1c   : > { %s2641_s13 = scalar_select %p2183_p8, 1, 0 }
  0x1d   : > { %p1653_p9 = pneg %p2183_p8  ;;  %s387_s18 = sshll.u32 %s2045_s17, 4  ;;  %s2198_s18 = int_to_ptr.vmem [resolvable:$true] %s387_s18 }
  0x1e   : > { %s2643_s2 = sld [smem:[#allocation26_spill]] }
  0x1f   : > { %p2194_p11 = pnand %p1653_p9, %p2623_p1 }
  0x21   : > { %p1774_p13 = pneg %p2194_p11 }
  0x24   : > { %s1772_s14 = scalar_lea.hbm %s2643_s2, 256 }
  0x25   : > { %p1773_p12 = scmp.ne.s32.totalorder %s2643_s2, %s1772_s14  ;;  %p1779_p5 = scmp.lt.u32.totalorder %s1772_s14, %s2643_s2 }
  0x27   : > { %p1775_p0 = pnand %p1774_p13, %p1773_p12 }
  0x29   : > { %p1776_p3 = pneg %p1775_p0 }
  0x2b   : > { %p1781_p7 = pnand %p1779_p5, %p1776_p3 }
  0x2d   : > { %1784 = shalt.err (!%p1781_p7)
}
  0x2e   : > { %s1785_s17 = scalar_lea.vmem %s2187_s15, 256  ;;  %p1793_p2 = scmp.lt.s32.totalorder %s2187_s15, %s2187_s15 }
  0x2f   : > { %p1786_p9 = scmp.ne.s32.totalorder %s2187_s15, %s1785_s17  ;;  %p1794_p12 = scmp.lt.s32.totalorder %s1785_s17, %s1785_s17 }
  0x31   : > { %p1788_p10 = pnand %p1786_p9, %p1774_p13  ;;  %p1795_p0 = por %p1794_p12, %p1793_p2 }
  0x33   : > { %p1789_p1 = pneg %p1788_p10 }
  0x35   : > { %p1796_p6 = pnand %p1795_p0, %p1789_p1 }
  0x37   : > { %1799 = shalt.err (!%p1796_p6)
}
  0x38   : > { %s2046_s10 = smov 64   ;;  %s2047_s21 = smov 4  }
  0x39   : > { %1656 = dma.hbm_to_vmem [thread:$0]  (!%p2194_p11), %s2643_s2, 256, %s2187_s15, [#allocation7], %s2046_s10, %s2046_s10, %s2047_s21  }
  0x3a   : > { %s2644_s4 = sld [smem:[#allocation27_spill]] }
  0x40   : > { %s1800_s14 = scalar_lea.hbm %s2644_s4, 256 }
  0x41   : > { %p1801_p2 = scmp.ne.s32.totalorder %s2644_s4, %s1800_s14  ;;  %p1807_p10 = scmp.lt.u32.totalorder %s1800_s14, %s2644_s4 }
  0x43   : > { %p1803_p1 = pnand %p1801_p2, %p1774_p13 }
  0x45   : > { %p1804_p6 = pneg %p1803_p1 }
  0x47   : > { %p1809_p3 = pnand %p1807_p10, %p1804_p6 }
  0x49   : > { %1812 = shalt.err (!%p1809_p3)
}
  0x4a   : > { %s1813_s15 = scalar_lea.vmem %s2198_s18, 256  ;;  %p1821_p12 = scmp.lt.s32.totalorder %s2198_s18, %s2198_s18 }
  0x4b   : > { %p1814_p5 = scmp.ne.s32.totalorder %s2198_s18, %s1813_s15  ;;  %p1822_p0 = scmp.lt.s32.totalorder %s1813_s15, %s1813_s15 }
  0x4d   : > { %p1816_p7 = pnand %p1814_p5, %p1774_p13  ;;  %p1823_p2 = por %p1822_p0, %p1821_p12 }
  0x4f   : > { %p1817_p9 = pneg %p1816_p7 }
  0x51   : > { %p1824_p1 = pnand %p1823_p2, %p1817_p9 }
  0x53   : > { %1827 = shalt.err (!%p1824_p1)
}
  0x54   : > { %1659 = dma.hbm_to_vmem [thread:$0]  (!%p2194_p11), %s2644_s4, 256, %s2198_s18, [#allocation10], %s2046_s10, %s2046_s10, %s2047_s21  }
  0x55   : > { %s48_s12 = sadd.s32 1, %s2038_s25  ;;  %s57_s28 = sadd.s32 1, %s2030_s23 }
  0x56   : > { %p50_p13 = scmp.ge.s32.totalorder %s48_s12, 2  ;;  %p64_p6 = scmp.ne.s32.totalorder %s2030_s23, %s2026_s22 }
  0x57   : > { %p65_p10 = scmp.eq.s32.totalorder %s2042_s26, 0  ;;  %p1679_p3 = scmp.lt.s32.totalorder %s2042_s26, 2 }
  0x58   : > { %s2673_s12 = smov (%p50_p13, %s48_s12), 0  ;;  %p2646_p7 = scmp.eq.s32.totalorder %s2162_s27, 1 }
  0x59   : > { %2645 = sst [smem:[#allocation24_spill]] %s2673_s12  ;;  %p66_p5 = por %p65_p10, %p64_p6 }
  0x5a   : > { %p2262_p9 = por %p2646_p7, %p64_p6  ;;  %s52_s30 = ssub.s32 %s2038_s25, %s2673_s12 }
  0x5b   : > { %s416_s19 = sand.u32 1, %s2030_s23   ;;  %p55_p12 = scmp.eq.s32.totalorder %s52_s30, 0 }
  0x5c   : > { %s2647_s16 = scalar_select %p2262_p9, 1, 0 }
  0x5d   : > { %s2269_s18 = sshll.u32 %s416_s19, 2  ;;  %s1495_s10 = sshll.u32 %s2038_s25, 6 }
  0x5e   : > { %s2273_s21 = scalar_select %p55_p12, %s2030_s23, %s57_s28  }
  0x5f   : > { %s2278_s17 = scalar_lea.hbm %s2606_s0, %s1495_s10  ;;  %s420_s15 = scalar_lea.vmem [#allocation3], %s2269_s18 }
  0x60   : > { %2648 = sst [smem:[#allocation25_spill]] %s2273_s21  ;;  %s428_s8 = sshll.u32 %s420_s15, 4  ;;  %s2287_s8 = int_to_ptr.vmem [resolvable:$true] %s428_s8 }
  0x61   : > { %p2283_p11 = pnand %p1679_p3, %p66_p5  ;;  %s2292_s20 = scalar_lea.hbm %s2607_s1, %s1495_s10 }
  0x62   : > { %s417_s14 = scalar_lea.sflag [#allocation4], %s416_s19  ;;  %s1828_s2 = scalar_lea.hbm %s2278_s17, 64 }
  0x63   : > { %p1829_p0 = scmp.ne.s32.totalorder %s2278_s17, %s1828_s2  ;;  %p1830_p2 = pneg %p2283_p11 }
  0x64   : > { %s1833_s12 = scalar_lea.hbm %s2606_s0, 128  ;;  %p1834_p6 = scmp.lt.u32.totalorder %s2278_s17, %s2606_s0 }
  0x65   : > { %p1831_p1 = pnand %p1830_p2, %p1829_p0  ;;  %p1835_p10 = scmp.lt.u32.totalorder %s1833_s12, %s1828_s2 }
  0x66   : > { %p1837_p5 = scmp.lt.u32.totalorder %s1828_s2, %s2278_s17 }
  0x67   : > { %p1832_p13 = pneg %p1831_p1  ;;  %p1836_p3 = por %p1835_p10, %p1834_p6 }
  0x69   : > { %p1838_p7 = por %p1837_p5, %p1836_p3 }
  0x6b   : > { %p1839_p12 = pnand %p1838_p7, %p1832_p13 }
  0x6d   : > { %1842 = shalt.err (!%p1839_p12)
}
  0x6e   : > { %s1843_s19 = scalar_lea.vmem %s2287_s8, 64  ;;  %s2048_s4 = smov [#allocation3]  }
  0x6f   : > { %p1844_p0 = scmp.ne.s32.totalorder %s2287_s8, %s1843_s19  ;;  %s1848_s10 = sshll.u32 %s2048_s4, 4  ;;  %s1849_s10 = int_to_ptr.vmem [resolvable:$false] %s1848_s10 }
  0x70   : > { %s1850_s25 = scalar_lea.vmem %s1849_s10, 128  ;;  %p1851_p4 = scmp.lt.s32.totalorder %s2287_s8, %s1849_s10 }
  0x71   : > { %p1846_p1 = pnand %p1844_p0, %p1830_p2  ;;  %p1852_p6 = scmp.lt.s32.totalorder %s1850_s25, %s1843_s19 }
  0x73   : > { %p1847_p9 = pneg %p1846_p1  ;;  %p1853_p10 = por %p1852_p6, %p1851_p4 }
  0x75   : > { %p1854_p3 = pnand %p1853_p10, %p1847_p9 }
  0x77   : > { %1857 = shalt.err (!%p1854_p3)
}
  0x78   : > { %1663 = dma.hbm_to_vmem [thread:$0]  (!%p2283_p11), %s2278_s17, 64, %s2287_s8, %s417_s14  }
  0x79   : > { %s435_s2 = sand.u32 1, %s2042_s26   ;;  %s439_s12 = scalar_lea.vmem [#allocation6], %s2269_s18 }
  0x7a   : > { %s446_s21 = sshll.u32 %s439_s12, 4  ;;  %s436_s28 = scalar_lea.sflag [#allocation7], %s435_s2  ;;  %s447_s21 = int_to_ptr.vmem [resolvable:$true] %s446_s21 }
  0x7b   : > { %s1858_s30 = scalar_lea.hbm %s2292_s20, 64  ;;  %s1863_s4 = scalar_lea.hbm %s2607_s1, 128 }
  0x7c   : > { %p1859_p4 = scmp.ne.s32.totalorder %s2292_s20, %s1858_s30  ;;  %p1864_p5 = scmp.lt.u32.totalorder %s2292_s20, %s2607_s1 }
  0x7d   : > { %p1865_p7 = scmp.lt.u32.totalorder %s1863_s4, %s1858_s30  ;;  %p1867_p0 = scmp.lt.u32.totalorder %s1858_s30, %s2292_s20 }
  0x7e   : > { %p1861_p9 = pnand %p1859_p4, %p1830_p2 }
  0x7f   : > { %p1866_p12 = por %p1865_p7, %p1864_p5 }
  0x80   : > { %p1862_p13 = pneg %p1861_p9 }
  0x81   : > { %p1868_p1 = por %p1867_p0, %p1866_p12 }
  0x83   : > { %p1869_p6 = pnand %p1868_p1, %p1862_p13 }
  0x85   : > { %1872 = shalt.err (!%p1869_p6)
}
  0x86   : > { %s1873_s18 = scalar_lea.vmem %s447_s21, 64  ;;  %s2049_s17 = smov [#allocation6]  }
  0x87   : > { %p1874_p10 = scmp.ne.s32.totalorder %s447_s21, %s1873_s18  ;;  %s1878_s8 = sshll.u32 %s2049_s17, 4  ;;  %s1879_s8 = int_to_ptr.vmem [resolvable:$false] %s1878_s8 }
  0x88   : > { %s1880_s14 = scalar_lea.vmem %s1879_s8, 128  ;;  %p1881_p9 = scmp.lt.s32.totalorder %s447_s21, %s1879_s8 }
  0x89   : > { %p1876_p3 = pnand %p1874_p10, %p1830_p2  ;;  %p1882_p8 = scmp.lt.s32.totalorder %s1880_s14, %s1873_s18 }
  0x8b   : > { %p1877_p4 = pneg %p1876_p3  ;;  %p1883_p5 = por %p1882_p8, %p1881_p9 }
  0x8d   : > { %p1884_p7 = pnand %p1883_p5, %p1877_p4 }
  0x8f   : > { %1887 = shalt.err (!%p1884_p7)
}
  0x90   : > { %1666 = dma.hbm_to_vmem [thread:$0]  (!%p2283_p11), %s2292_s20, 64, %s447_s21, %s436_s28  }
  0x91   : > { %p2650_p13 = scmp.ne.s32.totalorder %s2641_s13, 0 }
  0x92   : > { %s2343_s2 = sand.u32 (!%p2650_p13), 1, %s2026_s22   ;;  %p2651_p8 = scmp.ne.s32.totalorder (!%p2650_p13), %s2638_s29, 0 }
  0x93   : > { %455 = sbr.rel (%p2650_p13) target bundleno = 1959 (0x7a7), region = 60  ;;  %s2346_s12 = sshll.u32 (!%p2650_p13), %s2343_s2, 2 }
  0x94   : > { %s458_s30 = scalar_lea.sflag (!%p2650_p13), [#allocation4], %s2343_s2  ;;  %s461_s15 = scalar_lea.vmem (!%p2650_p13), [#allocation3], %s2346_s12 }
  0x9a   : > { %1997 = dma.done.wait (%p2651_p8), %s458_s30, 64  }
  0x9b   : > { %1999 = vsyncadd (%p2651_p8), %s458_s30, 4294967232  ;;  %s466_s13 = sand.u32 1, %s2162_s27   ;;  %s470_s20 = scalar_lea.vmem [#allocation6], %s2346_s12 }
  0x9c   : > { %s467_s9 = scalar_lea.sflag [#allocation7], %s466_s13 }
  0x9d   : > { %2001 = dma.done.wait (%p2651_p8), %s467_s9, 64  }
  0x9e   : > { %2003 = vsyncadd (%p2651_p8), %s467_s9, 4294967232  ;;  %p2652_p11 = scmp.eq.s32.totalorder %s2162_s27, 0 }
  0xa0   : > { %2005 = dma.done.wait (%p2652_p11), [#allocation7], 256   ;;  %p2653_p2 = pmov %p2652_p11 }
  0xa2   : > { %2007 = vsyncadd (%p2653_p2), [#allocation7], 4294967040  ;;  %p2654_p12 = pmov %p2653_p2 }
  0xa3   : > { %p2655_p0 = pmov %p2653_p2 }
  0xa4   : > { %2009 = dma.done.wait (%p2654_p12), [#allocation10], 256  }
  0xa5   : > { %2011 = vsyncadd (%p2655_p0), [#allocation10], 4294967040  ;;  %v2050_v0 = vmov 0.0   ;;  %vm2051_vm0 = vmmov 0   ;;  %v1748_v1 = vld [vmem:[#allocation9] sm:$0xff]   ;;  %v1749_v2 = vld [vmem:[#allocation8] sm:$0xff]   ;;  %v680_v31 = vlaneseq }
  0xa6   : > { %1571 = vmatprep.subr.bf16.mxu1 %v2050_v0  ;;  %1563 = vmatprep.subr.bf16.mxu0 %v2050_v0  ;;  %v1750_v3 = vld [vmem:[#allocation9 + $0x8] sm:$0xff]   ;;  %v1751_v4 = vld [vmem:[#allocation8 + $0x8] sm:$0xff]   ;;  %vm560_vm1 = vcmask 261120   ;;  %v2378_v6 = vld [vmem:[%s461_s15] sm:$0xf]  ;;  %vm690_vm2 = vcmask 64512  }
  0xa7   : > { %1575 = vmatprep.mubr.msk.bf16.mxu1 %vm2051_vm0, %v2050_v0  ;;  %1567 = vmatprep.mubr.msk.bf16.mxu0 %vm2051_vm0, %v2050_v0  ;;  %v536_v5 = vld [vmem:[%s470_s20] sm:$0xf]  ;;  %vm671_vm3 = vcmask 257024   ;;  %s2052_s4 = smov 112   ;;  %s2053_s10 = smov 120   ;;  %v681_v32 = vshrl.u32 %v680_v31, 7 }
  0xa8   : > { %1572 = vmatpush3.bf16.msra.mxu1 %v1748_v1  ;;  %1564 = vmatpush3.bf16.msra.mxu0 %v1749_v2  ;;  %v1510_v7 = vld [vmem:[%s2611_s5] ss:$0 sm:$0xff]  ;;  %s526_s25 = scalar_lea.vmem [#allocation12], %s2346_s12  ;;  %s2054_s18 = smov 104   ;;  %v686_v33 = vand.u32 127, %v680_v31  ;;  %vm754_vm5 = vcmask 1043456  }
  0xa9   : > { %1573 = vmatprep.subr.bf16.mxu1 %v2050_v0  ;;  %1565 = vmatprep.subr.bf16.mxu0 %v2050_v0  ;;  %v1506_v8 = vld [vmem:[%s2609_s3] ss:$0 sm:$0xff]  ;;  %v2055_v34 = vmov -1e+09   ;;  %s2056_s17 = smov 96   ;;  %s2057_s8 = smov 80  }
  0xaa   : > { %vm687_vm4 = vcmp.ge.s32.totalorder %v681_v32, %v686_v33  ;;  %s2058_s14 = smov 72   ;;  %s2059_s30 = smov 88   ;;  %vm914_vm6 = vcmask 130112   ;;  %vm1030_vm7 = vcmask 195712   ;;  %vm1146_vm8 = vcmask 261312  }
  0xab   : > { %v688_v35 = vsel %vm687_vm4, 0.0, %v2055_v34  ;;  %s2060_s15 = smov 8   ;;  %s2061_s28 = smov 16  }
  0xac   : > { %1574 = vmatpush3.bf16.msra.mxu1 %v1750_v3  ;;  %1566 = vmatpush3.bf16.msra.mxu0 %v1751_v4  ;;  %s2062_s19 = smov 24   ;;  %s2490_s9 = scalar_lea.sflag [#allocation13], %s466_s13 }
  0xad   : > { %1585 = vmatprep.subr.bf16.mxu1 %v2050_v0  ;;  %1579 = vmatprep.subr.bf16.mxu0 %v2050_v0  ;;  %p2656_p6 = scmp.ne.s32.totalorder %s2647_s16, 0 }
  0xaf   : > { %1576 = vmatmul.mubr.msk.bf16.vlgmr.msra.gmra.mrb[0].mxu1 %vm560_vm1, %v536_v5  ;;  %1568 = vmatmul.mubr.msk.bf16.vlgmr.msra.gmra.mrb[0].mxu0 %vm560_vm1, %v2378_v6 }
  0xb0   : > { %1587 = vmatprep.mubr.msk.bf16.mxu1 %vm2051_vm0, %v2050_v0  ;;  %1581 = vmatprep.mubr.msk.bf16.mxu0 %vm2051_vm0, %v2050_v0 }
 0x182   : > { %v664_v9 = vpop.f32.mrb[0].mxu1  ;;  %v598_v12 = vpop.f32.mrb[0].mxu0 }
 0x183   : > { %v665_v10 = vadd.f32 %v1510_v7, %v664_v9  ;;  %v1577_v11 = vpop.f32.mrb[1].mxu1  ;;  %v599_v14 = vadd.f32 %v1506_v8, %v598_v12  ;;  %v1569_v15 = vpop.f32.mrb[1].mxu0 }
 0x184   : > { %v667_v13 = vpop.f32.mrb[2].mxu1  ;;  %v601_v18 = vpop.f32.mrb[2].mxu0 }
 0x185   : > { %v2395_v16 = vpack.c.bf16 %v665_v10, %v665_v10  ;;  %v1578_v17 = vpop.f32.mrb[3].mxu1  ;;  %v1570_v19 = vpop.f32.mrb[3].mxu0  ;;  %v689_v20 = vpack.c.bf16 %v599_v14, %v599_v14 }
 0x187   : > { %918 = vrot.lane.b32.xlu1 %v2395_v16, %s2052_s4  ;;  %802 = vrot.lane.b32.xlu0 %v2395_v16, %s2053_s10  ;;  %v695_v21 = vsel %vm690_vm2, %v2395_v16, 0  ;;  %672 = vst.msk [vmem:[%s526_s25] sm:$0xf] %vm671_vm3, %v2395_v16 }
 0x188   : > { %1580 = vmatpush3.bf16.xpose.msra.mxu0 %v695_v21 }
 0x189   : > { %1591 = vmatprep.subr.bf16.mxu0 %v2050_v0 }
 0x18b   : > { %916 = vrot.lane.b32.xlu1 %v689_v20, %s2052_s4  ;;  %800 = vrot.lane.b32.xlu0 %v689_v20, %s2053_s10 }
 0x18f   : > { %1032 = vrot.lane.b32.xlu1 %v689_v20, %s2054_s18  ;;  %1034 = vrot.lane.b32.xlu0 %v2395_v16, %s2054_s18  ;;  %s2478_s18 = sshll.u32 %s2034_s24, 6 }
 0x190   : > { %1582 = vmatmul.mubr.msk.bf16.vlgmr.msra.gmra.mrb[4].mxu0 %vm690_vm2, %v689_v20 }
 0x191   : > { %1593 = vmatprep.mubr.msk.bf16.mxu0 %vm2051_vm0, %v2050_v0 }
 0x1f9   : > { %v803_v22 = vpop.permute.xlu0 %802  ;;  %v919_v24 = vpop.permute.xlu1 %918 }
 0x1fa   : > { %v808_v23 = vsel %vm690_vm2, %v803_v22, 0  ;;  %v924_v26 = vsel %vm690_vm2, %v919_v24, 0 }
 0x1fb   : > { %1592 = vmatpush3.bf16.xpose.msra.mxu0 %v808_v23 }
 0x1fc   : > { %1603 = vmatprep.subr.bf16.mxu0 %v2050_v0 }
 0x1fd   : > { %v801_v25 = vpop.permute.xlu0 %800  ;;  %v917_v28 = vpop.permute.xlu1 %916 }
 0x201   : > { %v1035_v27 = vpop.permute.xlu0 %1034  ;;  %v1033_v30 = vpop.permute.xlu1 %1032 }
 0x202   : > { %1594 = vmatmul.mubr.msk.bf16.vlgmr.msra.gmra.mrb[8].mxu0 %vm690_vm2, %v801_v25  ;;  %v1040_v29 = vsel %vm690_vm2, %v1035_v27, 0 }
 0x203   : > { %1604 = vmatpush3.bf16.xpose.msra.mxu0 %v924_v26  ;;  %1605 = vmatprep.mubr.msk.bf16.mxu0 %vm2051_vm0, %v2050_v0 }
 0x204   : > { %1615 = vmatprep.subr.bf16.mxu0 %v2050_v0 }
 0x20a   : > { %1606 = vmatmul.mubr.msk.bf16.vlgmr.msra.gmra.mrb[12].mxu0 %vm690_vm2, %v917_v28 }
 0x20b   : > { %1616 = vmatpush3.bf16.xpose.msra.mxu0 %v1040_v29  ;;  %1617 = vmatprep.mubr.msk.bf16.mxu0 %vm2051_vm0, %v2050_v0 }
 0x20c   : > { %1627 = vmatprep.subr.bf16.mxu0 %v2050_v0 }
 0x212   : > { %1618 = vmatmul.mubr.msk.bf16.vlgmr.msra.gmra.mrb[16].mxu0 %vm690_vm2, %v1033_v30 }
 0x213   : > { %1631 = vmatprep.mubr.msk.bf16.mxu0 %vm2051_vm0, %v2050_v0 }
 0x263   : > { %v731_v36 = vpop.f32.mrb[4].mxu0 }
 0x264   : > { %v732_v37 = vadd.f32 %v731_v36, %v688_v35  ;;  %v1583_v38 = vpop.f32.mrb[5].mxu0 }
 0x265   : > { %v734_v39 = vpop.f32.mrb[6].mxu0 }
 0x266   : > { %v1584_v40 = vpop.f32.mrb[7].mxu0  ;;  %v737_v41 = vsel %vm690_vm2, %v732_v37, -inf }
 0x267   : > { %738 = vmax.xlane.f32.xlu0 %v737_v41 }
 0x2d5   : > { %v844_v42 = vpop.f32.mrb[8].mxu0 }
 0x2d6   : > { %v845_v43 = vadd.f32 %v844_v42, %v688_v35  ;;  %v1595_v44 = vpop.f32.mrb[9].mxu0 }
 0x2d7   : > { %v847_v45 = vpop.f32.mrb[10].mxu0 }
 0x2d8   : > { %v1596_v46 = vpop.f32.mrb[11].mxu0  ;;  %v850_v47 = vsel %vm690_vm2, %v845_v43, -inf }
 0x2d9   : > { %851 = vmax.xlane.f32.xlu1 %v850_v47 }
 0x2dd   : > { %v960_v48 = vpop.f32.mrb[12].mxu0 }
 0x2de   : > { %v961_v49 = vadd.f32 %v960_v48, %v688_v35  ;;  %v1607_v50 = vpop.f32.mrb[13].mxu0 }
 0x2df   : > { %v963_v51 = vpop.f32.mrb[14].mxu0 }
 0x2e0   : > { %v1608_v52 = vpop.f32.mrb[15].mxu0  ;;  %v966_v53 = vsel %vm690_vm2, %v961_v49, -inf  ;;  %v1752_v51 = vld [vmem:[%s2612_s6] sm:$0xff]  }
 0x2e1   : > { %967 = vmax.xlane.f32.xlu0 %v966_v53  ;;  %1628 = vmatpush3.bf16.msra.mxu0 %v1752_v51  ;;  %v1753_v52 = vld [vmem:[%s2612_s6 + $0x8] sm:$0xff]  }
 0x2e2   : > { %1629 = vmatprep.subr.bf16.mxu0 %v2050_v0 }
 0x2e5   : > { %v1076_v54 = vpop.f32.mrb[16].mxu0  ;;  %1630 = vmatpush3.bf16.msra.mxu0 %v1753_v52 }
 0x2e6   : > { %v1077_v55 = vadd.f32 %v1076_v54, %v688_v35  ;;  %v1619_v56 = vpop.f32.mrb[17].mxu0 }
 0x2e7   : > { %v1079_v57 = vpop.f32.mrb[18].mxu0 }
 0x2e8   : > { %v1620_v58 = vpop.f32.mrb[19].mxu0  ;;  %v1082_v59 = vsel %vm690_vm2, %v1077_v55, -inf }
 0x2e9   : > { %1083 = vmax.xlane.f32.xlu0 %v1082_v59 }
 0x2f4   : > { %v739_v60 = vpop.xlane.xlu0 %738 }
 0x2f5   : > { %v740_v61 = vsub.f32 %v732_v37, %v739_v60 }
 0x2f7   : > { %v741_v62 = vmul.f32 1.442695, %v740_v61 }
 0x2f9   : > { %1754 = vpow2.f32 %v741_v62 }
 0x303   : > { %v1755_v63 = vpop.eup %1754 }
 0x304   : > { %v743_v1 = vsel %vm690_vm2, %v1755_v63, 0.0 }
 0x305   : > { %744 = vadd.xlane.f32.xlu1 %v743_v1 }
 0x316   : > { %749 = vrot.lane.b32.xlu1 %v2395_v16, %s2056_s17 }
 0x366   : > { %v852_v2 = vpop.xlane.xlu1 %851 }
 0x367   : > { %v853_v3 = vsub.f32 %v845_v43, %v852_v2  ;;  %v1523_v2 = vld [vmem:[%s2613_s7] ss:$0 sm:$0xff] }
 0x369   : > { %v854_v4 = vmul.f32 1.442695, %v853_v3  ;;  %v1216_v3 = vunpack.c.l.bf16 %v2378_v6 }
 0x36b   : > { %1756 = vpow2.f32 %v854_v4 }
 0x36e   : > { %v968_v5 = vpop.xlane.xlu0 %967 }
 0x36f   : > { %v969_v7 = vsub.f32 %v961_v49, %v968_v5 }
 0x371   : > { %v970_v8 = vmul.f32 1.442695, %v969_v7 }
 0x373   : > { %1758 = vpow2.f32 %v970_v8 }
 0x375   : > { %v1757_v9 = vpop.eup %1756 }
 0x376   : > { %v1084_v10 = vpop.xlane.xlu0 %1083  ;;  %v856_v11 = vsel %vm690_vm2, %v1757_v9, 0.0 }
 0x377   : > { %v1085_v12 = vsub.f32 %v1077_v55, %v1084_v10  ;;  %857 = vadd.xlane.f32.xlu0 %v856_v11 }
 0x379   : > { %v1086_v13 = vmul.f32 1.442695, %v1085_v12 }
 0x37b   : > { %1760 = vpow2.f32 %v1086_v13 }
 0x37d   : > { %v1759_v14 = vpop.eup %1758 }
 0x37e   : > { %v972_v15 = vsel %vm690_vm2, %v1759_v14, 0.0 }
 0x37f   : > { %973 = vadd.xlane.f32.xlu1 %v972_v15 }
 0x385   : > { %v1761_v17 = vpop.eup %1760 }
 0x386   : > { %v1088_v18 = vsel %vm690_vm2, %v1761_v17, 0.0 }
 0x387   : > { %1089 = vadd.xlane.f32.xlu0 %v1088_v18 }
 0x390   : > { %978 = vrot.lane.b32.xlu1 %v2395_v16, %s2057_s8  ;;  %s1289_s8 = sshll.u32 %s526_s25, 4  ;;  %s1290_s8 = int_to_ptr.vmem [resolvable:$true] %s1289_s8 }
 0x391   : > { %s1888_s20 = scalar_lea.vmem %s1290_s8, 64 }
 0x392   : > { %v745_v19 = vpop.xlane.xlu1 %744  ;;  %p1889_p1 = scmp.ne.s32.totalorder %s1290_s8, %s1888_s20 }
 0x393   : > { %1762 = vrcp.f32 %v745_v19 }
 0x394   : > { %1094 = vrot.lane.b32.xlu1 %v2395_v16, %s2058_s14  ;;  %p1890_p10 = pnand %p1889_p1, %p2656_p6 }
 0x396   : > { %v750_v20 = vpop.permute.xlu1 %749  ;;  %p1891_p3 = pneg %p1890_p10 }
 0x397   : > { %v756_v21 = vsel %vm754_vm5, %v750_v20, 0 }
 0x398   : > { %1586 = vmatpush3.bf16.msra.mxu1 %v756_v21 }
 0x399   : > { %1597 = vmatprep.subr.bf16.mxu1 %v2050_v0 }
 0x39d   : > { %v1763_v22 = vpop.eup %1762  ;;  %862 = vrot.lane.b32.xlu0 %v2395_v16, %s2059_s30 }
 0x39e   : > { %v747_v23 = vmul.f32 %v1763_v22, %v1755_v63 }
 0x3a0   : > { %v748_v24 = vpack.c.bf16 %v747_v23, %v747_v23 }
 0x3a2   : > { %1588 = vmatmul.mubr.msk.bf16.vlgmr.msra.gmra.mrb[4].mxu1 %vm690_vm2, %v748_v24 }
 0x3a3   : > { %1599 = vmatprep.mubr.msk.bf16.mxu1 %vm2051_vm0, %v2050_v0 }
 0x404   : > { %v858_v25 = vpop.xlane.xlu0 %857 }
 0x405   : > { %1764 = vrcp.f32 %v858_v25 }
 0x40c   : > { %v974_v26 = vpop.xlane.xlu1 %973 }
 0x40d   : > { %1766 = vrcp.f32 %v974_v26 }
 0x40f   : > { %v1765_v27 = vpop.eup %1764 }
 0x410   : > { %v860_v29 = vmul.f32 %v1765_v27, %v1757_v9  ;;  %v979_v32 = vpop.permute.xlu1 %978 }
 0x411   : > { %v984_v35 = vsel %vm754_vm5, %v979_v32, 0 }
 0x412   : > { %v861_v33 = vpack.c.bf16 %v860_v29, %v860_v29 }
 0x414   : > { %v1090_v28 = vpop.xlane.xlu0 %1089  ;;  %v1095_v37 = vpop.permute.xlu1 %1094 }
 0x415   : > { %1768 = vrcp.f32 %v1090_v28  ;;  %v1100_v40 = vsel %vm754_vm5, %v1095_v37, 0 }
 0x417   : > { %v1767_v34 = vpop.eup %1766 }
 0x418   : > { %v863_v30 = vpop.permute.xlu0 %862  ;;  %v976_v36 = vmul.f32 %v1767_v34, %v1759_v14 }
 0x419   : > { %v868_v31 = vsel %vm754_vm5, %v863_v30, 0 }
 0x41a   : > { %1598 = vmatpush3.bf16.msra.mxu1 %v868_v31  ;;  %v977_v38 = vpack.c.bf16 %v976_v36, %v976_v36 }
 0x41b   : > { %1609 = vmatprep.subr.bf16.mxu1 %v2050_v0 }
 0x41d   : > { %1600 = vmatmul.mubr.msk.bf16.vlgmr.msra.gmra.mrb[8].mxu1 %vm690_vm2, %v861_v33 }
 0x41e   : > { %1610 = vmatpush3.bf16.msra.mxu1 %v984_v35  ;;  %1611 = vmatprep.mubr.msk.bf16.mxu1 %vm2051_vm0, %v2050_v0 }
 0x41f   : > { %1621 = vmatprep.subr.bf16.mxu1 %v2050_v0  ;;  %v1769_v39 = vpop.eup %1768 }
 0x420   : > { %v1092_v41 = vmul.f32 %v1769_v39, %v1761_v17 }
 0x422   : > { %v1093_v42 = vpack.c.bf16 %v1092_v41, %v1092_v41 }
 0x425   : > { %1612 = vmatmul.mubr.msk.bf16.vlgmr.msra.gmra.mrb[12].mxu1 %vm690_vm2, %v977_v38 }
 0x426   : > { %1622 = vmatpush3.bf16.msra.mxu1 %v1100_v40  ;;  %1623 = vmatprep.mubr.msk.bf16.mxu1 %vm2051_vm0, %v2050_v0 }
 0x42d   : > { %1624 = vmatmul.mubr.msk.bf16.vlgmr.msra.gmra.mrb[16].mxu1 %vm690_vm2, %v1093_v42 }
 0x475   : > { %v792_v43 = vpop.f32.mrb[4].mxu1 }
 0x476   : > { %798 = vst.msk [vmem:[#allocation2] sm:$0xff] %vm690_vm2, %v792_v43  ;;  %v1589_v44 = vpop.f32.mrb[5].mxu1 }
 0x477   : > { %v795_v45 = vpop.f32.mrb[6].mxu1 }
 0x478   : > { %v1590_v46 = vpop.f32.mrb[7].mxu1 }
 0x4f0   : > { %v904_v47 = vpop.f32.mrb[8].mxu1 }
 0x4f1   : > { %911 = vrot.lane.b32.xlu0 %v904_v47, %s2060_s15  ;;  %v1601_v48 = vpop.f32.mrb[9].mxu1  ;;  %s2486_s15 = scalar_lea.hbm %s2617_s11, %s2478_s18 }
 0x4f2   : > { %v907_v49 = vpop.f32.mrb[10].mxu1 }
 0x4f3   : > { %v1602_v50 = vpop.f32.mrb[11].mxu1 }
 0x4f8   : > { %v1020_v53 = vpop.f32.mrb[12].mxu1 }
 0x4f9   : > { %1027 = vrot.lane.b32.xlu1 %v1020_v53, %s2061_s28  ;;  %v1613_v54 = vpop.f32.mrb[13].mxu1 }
 0x4fa   : > { %v1023_v55 = vpop.f32.mrb[14].mxu1 }
 0x4fb   : > { %v1614_v56 = vpop.f32.mrb[15].mxu1 }
 0x500   : > { %v1136_v57 = vpop.f32.mrb[16].mxu1 }
 0x501   : > { %1143 = vrot.lane.b32.xlu0 %v1136_v57, %s2062_s19  ;;  %v1625_v58 = vpop.f32.mrb[17].mxu1 }
 0x502   : > { %v1139_v59 = vpop.f32.mrb[18].mxu1 }
 0x503   : > { %v1626_v60 = vpop.f32.mrb[19].mxu1 }
 0x563   : > { %v912_v61 = vpop.permute.xlu0 %911 }
 0x564   : > { %915 = vst.msk [vmem:[#allocation2] sm:$0xff] %vm914_vm6, %v912_v61 }
 0x56b   : > { %v1028_v62 = vpop.permute.xlu1 %1027 }
 0x56c   : > { %1031 = vst.msk [vmem:[#allocation2] sm:$0xff] %vm1030_vm7, %v1028_v62 }
 0x573   : > { %v1144_v0 = vpop.permute.xlu0 %1143 }
 0x574   : > { %1147 = vst.msk [vmem:[#allocation2] sm:$0xff] %vm1146_vm8, %v1144_v0 }
 0x57b   : > { %v1148_v63 = vld [vmem:[#allocation2] sm:$0xff] }
 0x57c   : > { %v1149_v1 = vpack.c.bf16 %v1148_v63, %v1148_v63 }
 0x57e   : > { %1632 = vmatmul.mubr.msk.bf16.vlgmr.msra.gmra.mrb[20].mxu0 %vm560_vm1, %v1149_v1 }
 0x651   : > { %v1210_v4 = vpop.f32.mrb[20].mxu0 }
 0x652   : > { %v1211_v5 = vadd.f32 %v1523_v2, %v1210_v4  ;;  %v1633_v7 = vpop.f32.mrb[21].mxu0 }
 0x653   : > { %v1213_v8 = vpop.f32.mrb[22].mxu0 }
 0x654   : > { %v1634_v9 = vpop.f32.mrb[23].mxu0  ;;  %v1217_v10 = vadd.f32 %v1216_v3, %v1211_v5 }
 0x656   : > { %v1218_v11 = vsel %vm560_vm1, %v1217_v10, 0.0 }
 0x657   : > { %1219 = vadd.xlane.f32.xlu1 %v1218_v11 }
 0x6e4   : > { %v1220_v12 = vpop.xlane.xlu1 %1219 }
 0x6e5   : > { %v1222_v13 = vmul.f32 0.03125, %v1220_v12 }
 0x6e7   : > { %v2470_v14 = vsub.f32 %v1217_v10, %v1222_v13 }
 0x6e9   : > { %v1224_v6 = vmul.f32 %v2470_v14, %v2470_v14 }
 0x6eb   : > { %v1225_v15 = vsel %vm560_vm1, %v1224_v6, 0.0 }
 0x6ec   : > { %1226 = vadd.xlane.f32.xlu0 %v1225_v15 }
 0x702   : > { %676 = vrot.lane.b32.xlu0 %v2395_v16, %s2056_s17  ;;  %s2063_s17 = smov [#allocation12]  }
 0x703   : > { %s1892_s24 = sshll.u32 %s2063_s17, 4  ;;  %s1893_s24 = int_to_ptr.vmem [resolvable:$false] %s1892_s24 }
 0x704   : > { %s1894_s29 = scalar_lea.vmem %s1893_s24, 128  ;;  %p1895_p4 = scmp.lt.s32.totalorder %s1290_s8, %s1893_s24 }
 0x705   : > { %p1896_p9 = scmp.lt.s32.totalorder %s1894_s29, %s1888_s20 }
 0x707   : > { %p1897_p5 = por %p1896_p9, %p1895_p4 }
 0x709   : > { %p1898_p7 = pnand %p1897_p5, %p1891_p3 }
 0x70b   : > { %1901 = shalt.err (!%p1898_p7)
}
 0x70c   : > { %s1902_s27 = scalar_lea.hbm %s2486_s15, 64  ;;  %s1906_s21 = scalar_lea.hbm %s2617_s11, 128 }
 0x70d   : > { %p1903_p13 = scmp.ne.s32.totalorder %s2486_s15, %s1902_s27  ;;  %p1907_p2 = scmp.lt.u32.totalorder %s2486_s15, %s2617_s11 }
 0x70e   : > { %p1908_p12 = scmp.lt.u32.totalorder %s1906_s21, %s1902_s27  ;;  %p1910_p1 = scmp.lt.u32.totalorder %s1902_s27, %s2486_s15 }
 0x70f   : > { %p1904_p8 = pnand %p1903_p13, %p2656_p6 }
 0x710   : > { %p1909_p0 = por %p1908_p12, %p1907_p2 }
 0x711   : > { %p1905_p11 = pneg %p1904_p8 }
 0x712   : > { %p1911_p10 = por %p1910_p1, %p1909_p0 }
 0x714   : > { %p1912_p3 = pnand %p1911_p10, %p1905_p11 }
 0x716   : > { %1915 = shalt.err (!%p1912_p3)
}
 0x717   : > { %1648 = dma.vmem_to_hbm [thread:$0]  (%p2656_p6), %s1290_s8, 64, %s2486_s15, %s2490_s9  }
 0x718   : > { %s533_s4 = scalar_lea.vmem [#allocation14], %s2346_s12  ;;  %s2657_s20 = sld [smem:[#allocation31_spill]] }
 0x719   : > { %s1303_s10 = sshll.u32 %s533_s4, 4  ;;  %s2064_s15 = smov [#allocation14]   ;;  %s2517_s10 = int_to_ptr.vmem [resolvable:$true] %s1303_s10 }
 0x71a   : > { %s1916_s8 = scalar_lea.vmem %s2517_s10, 64  ;;  %s1920_s24 = sshll.u32 %s2064_s15, 4  ;;  %s1921_s24 = int_to_ptr.vmem [resolvable:$false] %s1920_s24 }
 0x71b   : > { %p1917_p4 = scmp.ne.s32.totalorder %s2517_s10, %s1916_s8  ;;  %s1922_s29 = scalar_lea.vmem %s1921_s24, 128 }
 0x71c   : > { %p1923_p7 = scmp.lt.s32.totalorder %s2517_s10, %s1921_s24  ;;  %p1924_p13 = scmp.lt.s32.totalorder %s1922_s29, %s1916_s8 }
 0x71d   : > { %p1918_p9 = pnand %p1917_p4, %p2656_p6 }
 0x71e   : > { %s2515_s17 = scalar_lea.hbm %s2657_s20, %s2478_s18  ;;  %p1925_p8 = por %p1924_p13, %p1923_p7 }
 0x71f   : > { %p1919_p5 = pneg %p1918_p9 }
 0x721   : > { %p1926_p11 = pnand %p1925_p8, %p1919_p5 }
 0x779   : > { %v1227_v16 = vpop.xlane.xlu0 %1226 }
 0x77a   : > { %v1228_v17 = vmul.f32 0.03125, %v1227_v16 }
 0x77c   : > { %v1229_v18 = vadd.f32 1e-05, %v1228_v17 }
 0x77d   : > { %v677_v19 = vpop.permute.xlu0 %676 }
 0x77e   : > { %1770 = vrsqrt.f32 %v1229_v18  ;;  %679 = vst.msk [vmem:[%s533_s4] sm:$0xf] %vm671_vm3, %v677_v19 }
 0x77f   : > { %1929 = shalt.err (!%p1926_p11)
}
 0x780   : > { %s1930_s27 = scalar_lea.hbm %s2515_s17, 64  ;;  %s1934_s21 = scalar_lea.hbm %s2657_s20, 128 }
 0x781   : > { %p1931_p2 = scmp.ne.s32.totalorder %s2515_s17, %s1930_s27  ;;  %p1935_p1 = scmp.lt.u32.totalorder %s2515_s17, %s2657_s20 }
 0x782   : > { %p1936_p10 = scmp.lt.u32.totalorder %s1934_s21, %s1930_s27  ;;  %p1938_p4 = scmp.lt.u32.totalorder %s1930_s27, %s2515_s17 }
 0x783   : > { %p1932_p12 = pnand %p1931_p2, %p2656_p6 }
 0x784   : > { %p1937_p3 = por %p1936_p10, %p1935_p1 }
 0x785   : > { %p1933_p0 = pneg %p1932_p12 }
 0x786   : > { %p1939_p9 = por %p1938_p4, %p1937_p3 }
 0x788   : > { %p1940_p5 = pnand %p1939_p9, %p1933_p0 }
 0x78a   : > { %1943 = shalt.err (!%p1940_p5)
}
 0x78b   : > { %1649 = dma.vmem_to_hbm [thread:$0]  (%p2656_p6), %s2517_s10, 64, %s2515_s17, %s2490_s9   ;;  %v1771_v20 = vpop.eup %1770 }
 0x78c   : > { %s2658_s30 = sld [smem:[#allocation28_spill]]  ;;  %v1231_v22 = vmul.f32 %v1771_v20, %v2470_v14  ;;  %s2659_s24 = sld [smem:[#allocation29_spill]] }
 0x78d   : > { %s519_s29 = scalar_lea.vmem [#allocation11], %s2346_s12  ;;  %s2660_s9 = sld [smem:[#allocation30_spill]] }
 0x78e   : > { %s1275_s27 = sshll.u32 %s519_s29, 4  ;;  %s1251_s17 = scalar_lea.sflag [#allocation5], %s2343_s2  ;;  %s2556_s27 = int_to_ptr.vmem [resolvable:$true] %s1275_s27 }
 0x78f   : > { %s1944_s21 = scalar_lea.vmem %s2556_s27, 64  ;;  %s2065_s12 = smov [#allocation11]  }
 0x790   : > { %p1945_p7 = scmp.ne.s32.totalorder %s2556_s27, %s1944_s21  ;;  %s1948_s28 = sshll.u32 %s2065_s12, 4  ;;  %s1949_s28 = int_to_ptr.vmem [resolvable:$false] %s1948_s28 }
 0x791   : > { %s1950_s19 = scalar_lea.vmem %s1949_s28, 128  ;;  %p1951_p11 = scmp.lt.s32.totalorder %s2556_s27, %s1949_s28 }
 0x792   : > { %v1527_v21 = vld [vmem:[%s2658_s30] ss:$0 sm:$0xff]  ;;  %p1946_p13 = pnand %p1945_p7, %p2656_p6  ;;  %p1952_p2 = scmp.lt.s32.totalorder %s1950_s19, %s1944_s21 }
 0x793   : > { %v1528_v23 = vld [vmem:[%s2659_s24] ss:$0 sm:$0xff]  ;;  %v1239_v24 = vmul.f32 %v1527_v21, %v1231_v22  ;;  %s2554_s10 = scalar_lea.hbm %s2660_s9, %s2478_s18 }
 0x794   : > { %p1947_p8 = pneg %p1946_p13  ;;  %p1953_p12 = por %p1952_p2, %p1951_p11 }
 0x795   : > { %v1247_v25 = vadd.f32 %v1528_v23, %v1239_v24 }
 0x796   : > { %p1954_p0 = pnand %p1953_p12, %p1947_p8 }
 0x797   : > { %v1248_v26 = vpack.c.bf16 %v1247_v25, %v1247_v25 }
 0x799   : > { %1249 = vst.msk [vmem:[%s519_s29] sm:$0xf] %vm671_vm3, %v1248_v26 }
 0x79a   : > { %1957 = shalt.err (!%p1954_p0)
}
 0x79b   : > { %s1958_s2 = scalar_lea.hbm %s2554_s10, 64  ;;  %s1962_s14 = scalar_lea.hbm %s2660_s9, 128 }
 0x79c   : > { %p1959_p1 = scmp.ne.s32.totalorder %s2554_s10, %s1958_s2  ;;  %p1963_p4 = scmp.lt.u32.totalorder %s2554_s10, %s2660_s9 }
 0x79d   : > { %p1964_p9 = scmp.lt.u32.totalorder %s1962_s14, %s1958_s2  ;;  %p1966_p7 = scmp.lt.u32.totalorder %s1958_s2, %s2554_s10 }
 0x79e   : > { %p1960_p10 = pnand %p1959_p1, %p2656_p6 }
 0x79f   : > { %p1965_p5 = por %p1964_p9, %p1963_p4 }
 0x7a0   : > { %p1961_p3 = pneg %p1960_p10 }
 0x7a1   : > { %p1967_p13 = por %p1966_p7, %p1965_p5 }
 0x7a3   : > { %p1968_p8 = pnand %p1967_p13, %p1961_p3 }
 0x7a5   : > { %1971 = shalt.err (!%p1968_p8)
}
 0x7a6   : > { %1647 = dma.vmem_to_hbm [thread:$0]  (%p2656_p6), %s2556_s27, 64, %s2554_s10, %s1251_s17  }
 0x7a7 PF: > { %s2661_s15 = sld [smem:[#allocation21_spill]]  ;;  %s2662_s24 = sld [smem:[#allocation23_spill]] }
 0x7a8   : > { %p2664_p2 = scmp.ge.s32.totalorder %s2042_s26, 2 }
 0x7ad   : > { %s1315_s29 = sand.u32 1, %s2661_s15   ;;  %p2663_p11 = scmp.ne.s32.totalorder %s2662_s24, 0 }
 0x7ae   : > { %s1316_s13 = scalar_lea.sflag [#allocation5], %s1315_s29 }
 0x7af   : > { %p1668_p12 = pnand %p2664_p2, %p2663_p11 }
 0x7b1   : > { %2013 = dma.done.wait (!%p1668_p12), %s1316_s13, 64  }
 0x7b2   : > { %2015 = vsyncadd (!%p1668_p12), %s1316_s13, 4294967232  ;;  %s2665_s25 = sadd.s32 4294967294, %s2042_s26  }
 0x7b3   : > { %s1324_s21 = sand.u32 1, %s2665_s25  }
 0x7b4   : > { %s1325_s12 = scalar_lea.sflag [#allocation13], %s1324_s21 }
 0x7b5   : > { %2017 = dma.done.wait (!%p1668_p12), %s1325_s12, 128  }
 0x7b6   : > { %2019 = vsyncadd (!%p1668_p12), %s1325_s12, 4294967168  ;;  %s36_s26 = sadd.s32 1, %s2042_s26   ;;  %s2666_s16 = sld [smem:[#allocation25_spill]] }
 0x7b7   : > { %p33_p6 = scmp.ge.s32.totalorder %s36_s26, 4   ;;  %s2667_s24 = sld [smem:[#allocation22_spill]] }
 0x7b8   : > { %s2668_s25 = sld [smem:[#allocation24_spill]]  ;;  %s2669_s21 = smov %s2026_s22 }
 0x7b9   : > { %s2670_s22 = smov %s2030_s23  ;;  %35 = sbr.rel (!%p33_p6) target bundleno = 18 (0x12), region = 158 }
 0x7bc   : > { %s2671_s23 = smov %s2666_s16 }
 0x7c0   :  { %1339 = vsyncpa [#allocation4], 1 }
 0x7c1   :  { %1341 = vsyncpa [#allocation4 + $0x1], 1 }
 0x7c2   :  { %1342 = vsyncpa [#allocation7], 1 }
 0x7c3   :  { %1344 = vsyncpa [#allocation7 + $0x1], 1 }
 0x7c4   :  { %1345 = vsyncpa [#allocation10], 1 }
 0x7c5   :  { %1346 = vsyncpa [#allocation5], 1 }
 0x7c6   :  { %1348 = vsyncpa [#allocation5 + $0x1], 1 }
 0x7c7   :  { %1349 = vsyncpa [#allocation13], 1 }
 0x7c8   :  { %1351 = vsyncpa [#allocation13 + $0x1], 1 }

</bundles_post_ra>
